<compile_context>
chip_gen: v7x
topology: tpu7x:2x2x1
jax: 0.10.0
libtpu: 0.0.40
codegen_flags: <defaults>
</compile_context>

<pallas_src>
import math
import numpy as np
import jax
import jax.numpy as jnp
from jax.experimental import pallas as pl
from jax.experimental.pallas import tpu as pltpu

T_DIM = 16
HIDDEN = 512
OUT_LANES = 128  # lane-dense padded output width


def _round_up(v, m):
    return ((v + m - 1) // m) * m


# ----------------------------- Mish ------------------------------------------ #

def _mish_kernel(v):
    # mish(x) = x * tanh(softplus(x))
    # tanh(log(1+e^x)) = u(u+2)/(u(u+2)+2), u = e^x  -> 1 EUP exp + 1 EUP reciprocal.
    u = jnp.exp(jnp.minimum(v, 20.0))
    n = u * (u + 2.0)
    return v * (n * pl.reciprocal(n + 2.0, approx=True))


def _mish_ref(v):
    # Faithful reference formulation (stable softplus + tanh), matches torch.nn.Mish.
    sp = jnp.maximum(v, 0.0) + jnp.log(1.0 + jnp.exp(-jnp.abs(v)))
    return v * jnp.tanh(sp)


# ----------------------------- fused kernel ---------------------------------- #

def fused_mlp_kernel(time_ref, xsa_ref,
                     freqs_ref, phase_ref,
                     tw1_ref, tb1_ref,
                     w1xsa_ref, w1t_ref, b1_ref,
                     w2_ref, b2_ref, w3_ref, b3_ref, w4_ref, b4_ref,
                     wf_ref, bf_ref, o_ref):
    f32 = jnp.float32
    bf16 = jnp.bfloat16

    # --- sinusoidal positional embedding: [sin | cos] == cos(arg - phase) ---
    arg = time_ref[...] * freqs_ref[...]                         # (BT, T_DIM)
    emb = jnp.cos(arg - phase_ref[...])

    # --- time MLP hidden: Linear(16,32) + Mish (tail Linear(32,16) folded into w1t) ---
    th = _mish_kernel(jnp.dot(emb, tw1_ref[...], preferred_element_type=f32)
                      + tb1_ref[...])

    # --- mid layer 1: xsa @ W1_xsa + th @ (tw2 @ W1_t) + (b1 + tb2 @ W1_t) ---
    h = (jnp.dot(xsa_ref[...], w1xsa_ref[...], preferred_element_type=f32)
         + jnp.dot(th.astype(bf16), w1t_ref[...], preferred_element_type=f32)
         + b1_ref[...])
    h = _mish_kernel(h)
    h = _mish_kernel(jnp.dot(h.astype(bf16), w2_ref[...], preferred_element_type=f32)
                     + b2_ref[...])
    h = _mish_kernel(jnp.dot(h.astype(bf16), w3_ref[...], preferred_element_type=f32)
                     + b3_ref[...])
    h = _mish_kernel(jnp.dot(h.astype(bf16), w4_ref[...], preferred_element_type=f32)
                     + b4_ref[...])

    # --- final layer (wf/bf padded to 128 lanes -> lane-dense store) ---
    o = jnp.dot(h.astype(bf16), wf_ref[...], preferred_element_type=f32) + bf_ref[...]
    o_ref[...] = o.astype(o_ref.dtype)


# ----------------------------- params ---------------------------------------- #

def _linear_params(key, fan_in, fan_out):
    # PyTorch nn.Linear default init: U(-1/sqrt(fan_in), 1/sqrt(fan_in))
    kw, kb = jax.random.split(key)
    bound = 1.0 / math.sqrt(fan_in)
    w = jax.random.uniform(kw, (fan_in, fan_out), jnp.float32, -bound, bound)
    b = jax.random.uniform(kb, (1, fan_out), jnp.float32, -bound, bound)
    return w, b


def init_mlp_params(key, x_dim, cond_dim, learn_sigma=False, t_dim=T_DIM):
    keys = jax.random.split(key, 7)
    input_dim = x_dim + cond_dim + t_dim
    out_dim = 2 * x_dim if learn_sigma else x_dim
    p = {}
    p["tw1"], p["tb1"] = _linear_params(keys[0], t_dim, t_dim * 2)
    p["tw2"], p["tb2"] = _linear_params(keys[1], t_dim * 2, t_dim)
    p["w1"], p["b1"] = _linear_params(keys[2], input_dim, HIDDEN)
    p["w2"], p["b2"] = _linear_params(keys[3], HIDDEN, HIDDEN)
    p["w3"], p["b3"] = _linear_params(keys[4], HIDDEN, HIDDEN)
    p["w4"], p["b4"] = _linear_params(keys[5], HIDDEN, HIDDEN)
    p["wf"], p["bf"] = _linear_params(keys[6], HIDDEN, out_dim)
    return p


def prepare_params(params, x_dim, s_dim, a_dim, t_dim=T_DIM):
    """One-time weight massaging: fold, repack, pad, cast to bf16."""
    f32 = jnp.float32
    bf16 = jnp.bfloat16
    xsa_dim = x_dim + s_dim + a_dim
    k_pad = _round_up(xsa_dim, 8)

    half = t_dim // 2
    freqs = jnp.exp(jnp.arange(half, dtype=f32) * -(math.log(10000.0) / (half - 1)))
    freqs2 = jnp.concatenate([freqs, freqs])[None, :]                       # (1, t_dim)
    phase = jnp.concatenate([jnp.full((half,), math.pi / 2.0, f32),
                             jnp.zeros((half,), f32)])[None, :]             # (1, t_dim)

    # Row-split W1 according to the torch concat order: [x, t, state, action].
    w1 = params["w1"]
    w1x = w1[:x_dim]
    w1t = w1[x_dim:x_dim + t_dim]
    w1s = w1[x_dim + t_dim:x_dim + t_dim + s_dim]
    w1a = w1[x_dim + t_dim + s_dim:]

    # Pack x/state/action rows into one block (K padded to a sublane multiple).
    w1xsa = jnp.concatenate([w1x, w1s, w1a], axis=0)
    w1xsa = jnp.pad(w1xsa, ((0, k_pad - xsa_dim), (0, 0)))

    # Fold the time-MLP tail Linear(32,16) into layer 1 (algebraically exact).
    w1t_fold = params["tw2"] @ w1t                      # (32, 512)
    b1_fold = params["b1"] + params["tb2"] @ w1t        # (1, 512)

    out_dim = params["wf"].shape[-1]
    out_pad = max(OUT_LANES, _round_up(out_dim, OUT_LANES))
    wf_p = jnp.pad(params["wf"], ((0, 0), (0, out_pad - out_dim)))
    bf_p = jnp.pad(params["bf"], ((0, 0), (0, out_pad - out_dim)))

    return {
        "freqs2": freqs2, "phase": phase,
        "tw1": params["tw1"].astype(f32), "tb1": params["tb1"].astype(f32),
        "w1xsa": w1xsa.astype(bf16), "w1t": w1t_fold.astype(bf16),
        "b1": b1_fold.astype(f32),
        "w2": params["w2"].astype(bf16), "b2": params["b2"].astype(f32),
        "w3": params["w3"].astype(bf16), "b3": params["b3"].astype(f32),
        "w4": params["w4"].astype(bf16), "b4": params["b4"].astype(f32),
        "wf": wf_p.astype(bf16), "bf": bf_p.astype(f32),
        "dims": (x_dim, s_dim, a_dim, xsa_dim, k_pad, out_dim, out_pad),
    }


# ----------------------------- tiling ----------------------------------------- #

def _num_tensorcores():
    try:
        kind = jax.devices()[0].device_kind.lower()
    except Exception:
        return 1
    return 2 if ("v7" in kind or "7x" in kind) else 1


def _choose_bt(B):
    b8 = _round_up(max(B, 1), 8)
    if _num_tensorcores() >= 2 and B > 16:
        # v7x: guarantee >=2 balanced grid steps so both TensorCores get work.
        bt = _round_up(-(-b8 // 2), 8)
        return min(bt, 512)
    # v5e / v6e: single TensorCore -> fewer, bigger steps amortize per-step overhead.
    return min(b8, 512)


# ----------------------------- wrapper ----------------------------------------- #

def _pad_rows(a, rows):
    if a.shape[0] == rows:
        return a
    return jnp.pad(a, ((0, rows - a.shape[0]),) + ((0, 0),) * (a.ndim - 1))


def _resident_spec(shape):
    # Whole (constant) array resident across the batch grid.
    return pl.BlockSpec(shape, lambda i: (0,) * len(shape))


def mlp_forward(prep, x, time, state, action):
    f32 = jnp.float32
    bf16 = jnp.bfloat16
    _, _, _, xsa_dim, k_pad, out_dim, out_pad = prep["dims"]

    B = x.shape[0]
    BT = _choose_bt(B)
    BP = _round_up(_round_up(max(B, 1), 8), BT)
    grid = (BP // BT,)

    # Hot-path input prep: pad batch, concat x/state/action (bf16 to halve the DMA).
    time_p = _pad_rows(time.astype(f32)[:, None], BP)                       # (BP, 1)
    xsa = jnp.concatenate([x.astype(bf16), state.astype(bf16),
                           action.astype(bf16)], axis=-1)                   # (B, xsa)
    xsa_p = jnp.pad(xsa, ((0, BP - B), (0, k_pad - xsa_dim)))               # (BP, k_pad)

    in_arrays = [
        time_p, xsa_p,
        prep["freqs2"], prep["phase"],
        prep["tw1"], prep["tb1"],
        prep["w1xsa"], prep["w1t"], prep["b1"],
        prep["w2"], prep["b2"], prep["w3"], prep["b3"], prep["w4"], prep["b4"],
        prep["wf"], prep["bf"],
    ]
    in_specs = [
        pl.BlockSpec((BT, 1), lambda i: (i, 0)),
        pl.BlockSpec((BT, k_pad), lambda i: (i, 0)),
    ] + [_resident_spec(a.shape) for a in in_arrays[2:]]

    out = pl.pallas_call(
        fused_mlp_kernel,
        out_shape=jax.ShapeDtypeStruct((BP, out_pad), f32),
        grid_spec=pltpu.PrefetchScalarGridSpec(
            num_scalar_prefetch=0,
            grid=grid,
            in_specs=in_specs,
            out_specs=pl.BlockSpec((BT, out_pad), lambda i: (i, 0)),
        ),
        compiler_params=pltpu.CompilerParams(
            dimension_semantics=("parallel",),
            vmem_limit_bytes=48 * 1024 * 1024,
        ),
    )(*in_arrays)

    return out[:B, :out_dim]


# ----------------------------- pure-JAX reference ----------------------------- #

def mlp_reference(params, x, time, state, action, t_dim=T_DIM):
    half = t_dim // 2
    freqs = jnp.exp(jnp.arange(half, dtype=jnp.float32)
                    * -(math.log(10000.0) / (half - 1)))
    e = time[:, None] * freqs[None, :]
    emb = jnp.concatenate([jnp.sin(e), jnp.cos(e)], axis=-1)
    t = _mish_ref(emb @ params["tw1"] + params["tb1"]) @ params["tw2"] + params["tb2"]
    h = jnp.concatenate([x, t, state, action], axis=-1)
    for wk, bk in (("w1", "b1"), ("w2", "b2"), ("w3", "b3"), ("w4", "b4")):
        h = _mish_ref(h @ params[wk] + params[bk])
    return h @ params["wf"] + params["bf"]


# ----------------------------- main -------------------------------------------- #

if __name__ == "__main__":
    key = jax.random.PRNGKey(0)
    k_param, kx, kt, ks, ka = jax.random.split(key, 5)

    B = 2
    x_dim = 4
    state_dim = 5
    action_dim = 3
    cond_dim = state_dim + action_dim

    params = init_mlp_params(k_param, x_dim, cond_dim, learn_sigma=False)
    prep = prepare_params(params, x_dim, state_dim, action_dim)

    x = jax.random.normal(kx, (B, x_dim), jnp.float32)
    time = jax.random.uniform(kt, (B,), jnp.float32, 0.0, 100.0)
    state = jax.random.normal(ks, (B, state_dim), jnp.float32)
    action = jax.random.normal(ka, (B, action_dim), jnp.float32)

    out = mlp_forward(prep, x, time, state, action)
    out = jax.block_until_ready(out)

    ref = mlp_reference(params, x, time, state, action)
    # bf16 MXU operands (f32 accumulation) + approx reciprocal in Mish -> loosened tolerance.
    np.testing.assert_allclose(np.asarray(out), np.asarray(ref), atol=5e-2, rtol=5e-2)

    print("KERNEL_OK")
</pallas_src>

<mosaic_0001>
module attributes {stable_mosaic.version = 11 : i64} {
  func.func @fused_mlp_kernel(%arg0: i32, %arg1: memref<8x1xf32, #tpu.memory_space<vmem>>, %arg2: memref<8x16xbf16, #tpu.memory_space<vmem>>, %arg3: memref<1x16xf32, #tpu.memory_space<vmem>>, %arg4: memref<1x16xf32, #tpu.memory_space<vmem>>, %arg5: memref<16x32xf32, #tpu.memory_space<vmem>>, %arg6: memref<1x32xf32, #tpu.memory_space<vmem>>, %arg7: memref<16x512xbf16, #tpu.memory_space<vmem>>, %arg8: memref<32x512xbf16, #tpu.memory_space<vmem>>, %arg9: memref<1x512xf32, #tpu.memory_space<vmem>>, %arg10: memref<512x512xbf16, #tpu.memory_space<vmem>>, %arg11: memref<1x512xf32, #tpu.memory_space<vmem>>, %arg12: memref<512x512xbf16, #tpu.memory_space<vmem>>, %arg13: memref<1x512xf32, #tpu.memory_space<vmem>>, %arg14: memref<512x512xbf16, #tpu.memory_space<vmem>>, %arg15: memref<1x512xf32, #tpu.memory_space<vmem>>, %arg16: memref<512x128xbf16, #tpu.memory_space<vmem>>, %arg17: memref<1x128xf32, #tpu.memory_space<vmem>>, %arg18: memref<8x128xf32, #tpu.memory_space<vmem>>) attributes {dimension_semantics = [#tpu.dimension_semantics<parallel>], iteration_bounds = array<i64: 1>, scalar_prefetch = 0 : i64, scratch_operands = 0 : i64, tpu.core_type = #tpu.core_type<tc>, window_params = [{transform_indices = @transform_0, window_bounds = array<i64: 8, 1>}, {transform_indices = @transform_1, window_bounds = array<i64: 8, 16>}, {pipeline_mode = #tpu.pipeline_mode<synchronous>, transform_indices = @transform_2, window_bounds = array<i64: 1, 16>}, {pipeline_mode = #tpu.pipeline_mode<synchronous>, transform_indices = @transform_3, window_bounds = array<i64: 1, 16>}, {pipeline_mode = #tpu.pipeline_mode<synchronous>, transform_indices = @transform_4, window_bounds = array<i64: 16, 32>}, {pipeline_mode = #tpu.pipeline_mode<synchronous>, transform_indices = @transform_5, window_bounds = array<i64: 1, 32>}, {pipeline_mode = #tpu.pipeline_mode<synchronous>, transform_indices = @transform_6, window_bounds = array<i64: 16, 512>}, {pipeline_mode = #tpu.pipeline_mode<synchronous>, transform_indices = @transform_7, window_bounds = array<i64: 32, 512>}, {pipeline_mode = #tpu.pipeline_mode<synchronous>, transform_indices = @transform_8, window_bounds = array<i64: 1, 512>}, {pipeline_mode = #tpu.pipeline_mode<synchronous>, transform_indices = @transform_9, window_bounds = array<i64: 512, 512>}, {pipeline_mode = #tpu.pipeline_mode<synchronous>, transform_indices = @transform_10, window_bounds = array<i64: 1, 512>}, {pipeline_mode = #tpu.pipeline_mode<synchronous>, transform_indices = @transform_11, window_bounds = array<i64: 512, 512>}, {pipeline_mode = #tpu.pipeline_mode<synchronous>, transform_indices = @transform_12, window_bounds = array<i64: 1, 512>}, {pipeline_mode = #tpu.pipeline_mode<synchronous>, transform_indices = @transform_13, window_bounds = array<i64: 512, 512>}, {pipeline_mode = #tpu.pipeline_mode<synchronous>, transform_indices = @transform_14, window_bounds = array<i64: 1, 512>}, {pipeline_mode = #tpu.pipeline_mode<synchronous>, transform_indices = @transform_15, window_bounds = array<i64: 512, 128>}, {pipeline_mode = #tpu.pipeline_mode<synchronous>, transform_indices = @transform_16, window_bounds = array<i64: 1, 128>}, {transform_indices = @transform_17, window_bounds = array<i64: 8, 128>}]} {
    %c0 = arith.constant 0 : index
    %c0_0 = arith.constant 0 : index
    %0 = vector.load %arg1[%c0, %c0_0] : memref<8x1xf32, #tpu.memory_space<vmem>>, vector<8x1xf32>
    %c0_1 = arith.constant 0 : index
    %c0_2 = arith.constant 0 : index
    %1 = vector.load %arg3[%c0_1, %c0_2] : memref<1x16xf32, #tpu.memory_space<vmem>>, vector<1x16xf32>
    %2 = vector.broadcast %0 : vector<8x1xf32> to vector<8x16xf32>
    %3 = vector.broadcast %1 : vector<1x16xf32> to vector<8x16xf32>
    %4 = arith.mulf %2, %3 : vector<8x16xf32>
    %c0_3 = arith.constant 0 : index
    %c0_4 = arith.constant 0 : index
    %5 = vector.load %arg4[%c0_3, %c0_4] : memref<1x16xf32, #tpu.memory_space<vmem>>, vector<1x16xf32>
    %6 = vector.broadcast %5 : vector<1x16xf32> to vector<8x16xf32>
    %7 = arith.subf %4, %6 : vector<8x16xf32>
    %8 = math.cos %7 : vector<8x16xf32>
    %c0_5 = arith.constant 0 : index
    %c0_6 = arith.constant 0 : index
    %9 = vector.load %arg5[%c0_5, %c0_6] : memref<16x32xf32, #tpu.memory_space<vmem>>, vector<16x32xf32>
    %cst = arith.constant dense<0.000000e+00> : vector<8x32xf32>
    %10 = tpu.matmul %8, %9, %cst {dimension_numbers = #tpu.dot_dimension_numbers<[1], [0], [0], [1], [0, 0, 1, 1], [], []>} : vector<8x16xf32>, vector<16x32xf32>, vector<8x32xf32> -> vector<8x32xf32>
    %c0_7 = arith.constant 0 : index
    %c0_8 = arith.constant 0 : index
    %11 = vector.load %arg6[%c0_7, %c0_8] : memref<1x32xf32, #tpu.memory_space<vmem>>, vector<1x32xf32>
    %12 = vector.broadcast %11 : vector<1x32xf32> to vector<8x32xf32>
    %13 = arith.addf %10, %12 : vector<8x32xf32>
    %cst_9 = arith.constant 2.000000e+01 : f32
    %14 = vector.broadcast %cst_9 : f32 to vector<8x32xf32>
    %15 = arith.minimumf %13, %14 : vector<8x32xf32>
    %16 = math.exp %15 : vector<8x32xf32>
    %cst_10 = arith.constant 2.000000e+00 : f32
    %17 = vector.broadcast %cst_10 : f32 to vector<8x32xf32>
    %18 = arith.addf %16, %17 : vector<8x32xf32>
    %19 = arith.mulf %16, %18 : vector<8x32xf32>
    %cst_11 = arith.constant 2.000000e+00 : f32
    %20 = vector.broadcast %cst_11 : f32 to vector<8x32xf32>
    %21 = arith.addf %19, %20 : vector<8x32xf32>
    %22 = tpu.reciprocal %21 {approx = true} : vector<8x32xf32> -> vector<8x32xf32>
    %23 = arith.mulf %19, %22 : vector<8x32xf32>
    %24 = arith.mulf %13, %23 : vector<8x32xf32>
    %c0_12 = arith.constant 0 : index
    %c0_13 = arith.constant 0 : index
    %25 = vector.load %arg2[%c0_12, %c0_13] : memref<8x16xbf16, #tpu.memory_space<vmem>>, vector<8x16xbf16>
    %c0_14 = arith.constant 0 : index
    %c0_15 = arith.constant 0 : index
    %26 = vector.load %arg7[%c0_14, %c0_15] : memref<16x512xbf16, #tpu.memory_space<vmem>>, vector<16x512xbf16>
    %cst_16 = arith.constant dense<0.000000e+00> : vector<8x512xf32>
    %27 = tpu.matmul %25, %26, %cst_16 {dimension_numbers = #tpu.dot_dimension_numbers<[1], [0], [0], [1], [0, 0, 1, 1], [], []>} : vector<8x16xbf16>, vector<16x512xbf16>, vector<8x512xf32> -> vector<8x512xf32>
    %28 = arith.truncf %24 : vector<8x32xf32> to vector<8x32xbf16>
    %c0_17 = arith.constant 0 : index
    %c0_18 = arith.constant 0 : index
    %29 = vector.load %arg8[%c0_17, %c0_18] : memref<32x512xbf16, #tpu.memory_space<vmem>>, vector<32x512xbf16>
    %cst_19 = arith.constant dense<0.000000e+00> : vector<8x512xf32>
    %30 = tpu.matmul %28, %29, %cst_19 {dimension_numbers = #tpu.dot_dimension_numbers<[1], [0], [0], [1], [0, 0, 1, 1], [], []>} : vector<8x32xbf16>, vector<32x512xbf16>, vector<8x512xf32> -> vector<8x512xf32>
    %31 = arith.addf %27, %30 : vector<8x512xf32>
    %c0_20 = arith.constant 0 : index
    %c0_21 = arith.constant 0 : index
    %32 = vector.load %arg9[%c0_20, %c0_21] : memref<1x512xf32, #tpu.memory_space<vmem>>, vector<1x512xf32>
    %33 = vector.broadcast %32 : vector<1x512xf32> to vector<8x512xf32>
    %34 = arith.addf %31, %33 : vector<8x512xf32>
    %cst_22 = arith.constant 2.000000e+01 : f32
    %35 = vector.broadcast %cst_22 : f32 to vector<8x512xf32>
    %36 = arith.minimumf %34, %35 : vector<8x512xf32>
    %37 = math.exp %36 : vector<8x512xf32>
    %cst_23 = arith.constant 2.000000e+00 : f32
    %38 = vector.broadcast %cst_23 : f32 to vector<8x512xf32>
    %39 = arith.addf %37, %38 : vector<8x512xf32>
    %40 = arith.mulf %37, %39 : vector<8x512xf32>
    %cst_24 = arith.constant 2.000000e+00 : f32
    %41 = vector.broadcast %cst_24 : f32 to vector<8x512xf32>
    %42 = arith.addf %40, %41 : vector<8x512xf32>
    %43 = tpu.reciprocal %42 {approx = true} : vector<8x512xf32> -> vector<8x512xf32>
    %44 = arith.mulf %40, %43 : vector<8x512xf32>
    %45 = arith.mulf %34, %44 : vector<8x512xf32>
    %46 = arith.truncf %45 : vector<8x512xf32> to vector<8x512xbf16>
    %c0_25 = arith.constant 0 : index
    %c0_26 = arith.constant 0 : index
    %47 = vector.load %arg10[%c0_25, %c0_26] : memref<512x512xbf16, #tpu.memory_space<vmem>>, vector<512x512xbf16>
    %cst_27 = arith.constant dense<0.000000e+00> : vector<8x512xf32>
    %48 = tpu.matmul %46, %47, %cst_27 {dimension_numbers = #tpu.dot_dimension_numbers<[1], [0], [0], [1], [0, 0, 1, 1], [], []>} : vector<8x512xbf16>, vector<512x512xbf16>, vector<8x512xf32> -> vector<8x512xf32>
    %c0_28 = arith.constant 0 : index
    %c0_29 = arith.constant 0 : index
    %49 = vector.load %arg11[%c0_28, %c0_29] : memref<1x512xf32, #tpu.memory_space<vmem>>, vector<1x512xf32>
    %50 = vector.broadcast %49 : vector<1x512xf32> to vector<8x512xf32>
    %51 = arith.addf %48, %50 : vector<8x512xf32>
    %cst_30 = arith.constant 2.000000e+01 : f32
    %52 = vector.broadcast %cst_30 : f32 to vector<8x512xf32>
    %53 = arith.minimumf %51, %52 : vector<8x512xf32>
    %54 = math.exp %53 : vector<8x512xf32>
    %cst_31 = arith.constant 2.000000e+00 : f32
    %55 = vector.broadcast %cst_31 : f32 to vector<8x512xf32>
    %56 = arith.addf %54, %55 : vector<8x512xf32>
    %57 = arith.mulf %54, %56 : vector<8x512xf32>
    %cst_32 = arith.constant 2.000000e+00 : f32
    %58 = vector.broadcast %cst_32 : f32 to vector<8x512xf32>
    %59 = arith.addf %57, %58 : vector<8x512xf32>
    %60 = tpu.reciprocal %59 {approx = true} : vector<8x512xf32> -> vector<8x512xf32>
    %61 = arith.mulf %57, %60 : vector<8x512xf32>
    %62 = arith.mulf %51, %61 : vector<8x512xf32>
    %63 = arith.truncf %62 : vector<8x512xf32> to vector<8x512xbf16>
    %c0_33 = arith.constant 0 : index
    %c0_34 = arith.constant 0 : index
    %64 = vector.load %arg12[%c0_33, %c0_34] : memref<512x512xbf16, #tpu.memory_space<vmem>>, vector<512x512xbf16>
    %cst_35 = arith.constant dense<0.000000e+00> : vector<8x512xf32>
    %65 = tpu.matmul %63, %64, %cst_35 {dimension_numbers = #tpu.dot_dimension_numbers<[1], [0], [0], [1], [0, 0, 1, 1], [], []>} : vector<8x512xbf16>, vector<512x512xbf16>, vector<8x512xf32> -> vector<8x512xf32>
    %c0_36 = arith.constant 0 : index
    %c0_37 = arith.constant 0 : index
    %66 = vector.load %arg13[%c0_36, %c0_37] : memref<1x512xf32, #tpu.memory_space<vmem>>, vector<1x512xf32>
    %67 = vector.broadcast %66 : vector<1x512xf32> to vector<8x512xf32>
    %68 = arith.addf %65, %67 : vector<8x512xf32>
    %cst_38 = arith.constant 2.000000e+01 : f32
    %69 = vector.broadcast %cst_38 : f32 to vector<8x512xf32>
    %70 = arith.minimumf %68, %69 : vector<8x512xf32>
    %71 = math.exp %70 : vector<8x512xf32>
    %cst_39 = arith.constant 2.000000e+00 : f32
    %72 = vector.broadcast %cst_39 : f32 to vector<8x512xf32>
    %73 = arith.addf %71, %72 : vector<8x512xf32>
    %74 = arith.mulf %71, %73 : vector<8x512xf32>
    %cst_40 = arith.constant 2.000000e+00 : f32
    %75 = vector.broadcast %cst_40 : f32 to vector<8x512xf32>
    %76 = arith.addf %74, %75 : vector<8x512xf32>
    %77 = tpu.reciprocal %76 {approx = true} : vector<8x512xf32> -> vector<8x512xf32>
    %78 = arith.mulf %74, %77 : vector<8x512xf32>
    %79 = arith.mulf %68, %78 : vector<8x512xf32>
    %80 = arith.truncf %79 : vector<8x512xf32> to vector<8x512xbf16>
    %c0_41 = arith.constant 0 : index
    %c0_42 = arith.constant 0 : index
    %81 = vector.load %arg14[%c0_41, %c0_42] : memref<512x512xbf16, #tpu.memory_space<vmem>>, vector<512x512xbf16>
    %cst_43 = arith.constant dense<0.000000e+00> : vector<8x512xf32>
    %82 = tpu.matmul %80, %81, %cst_43 {dimension_numbers = #tpu.dot_dimension_numbers<[1], [0], [0], [1], [0, 0, 1, 1], [], []>} : vector<8x512xbf16>, vector<512x512xbf16>, vector<8x512xf32> -> vector<8x512xf32>
    %c0_44 = arith.constant 0 : index
    %c0_45 = arith.constant 0 : index
    %83 = vector.load %arg15[%c0_44, %c0_45] : memref<1x512xf32, #tpu.memory_space<vmem>>, vector<1x512xf32>
    %84 = vector.broadcast %83 : vector<1x512xf32> to vector<8x512xf32>
    %85 = arith.addf %82, %84 : vector<8x512xf32>
    %cst_46 = arith.constant 2.000000e+01 : f32
    %86 = vector.broadcast %cst_46 : f32 to vector<8x512xf32>
    %87 = arith.minimumf %85, %86 : vector<8x512xf32>
    %88 = math.exp %87 : vector<8x512xf32>
    %cst_47 = arith.constant 2.000000e+00 : f32
    %89 = vector.broadcast %cst_47 : f32 to vector<8x512xf32>
    %90 = arith.addf %88, %89 : vector<8x512xf32>
    %91 = arith.mulf %88, %90 : vector<8x512xf32>
    %cst_48 = arith.constant 2.000000e+00 : f32
    %92 = vector.broadcast %cst_48 : f32 to vector<8x512xf32>
    %93 = arith.addf %91, %92 : vector<8x512xf32>
    %94 = tpu.reciprocal %93 {approx = true} : vector<8x512xf32> -> vector<8x512xf32>
    %95 = arith.mulf %91, %94 : vector<8x512xf32>
    %96 = arith.mulf %85, %95 : vector<8x512xf32>
    %97 = arith.truncf %96 : vector<8x512xf32> to vector<8x512xbf16>
    %c0_49 = arith.constant 0 : index
    %c0_50 = arith.constant 0 : index
    %98 = vector.load %arg16[%c0_49, %c0_50] : memref<512x128xbf16, #tpu.memory_space<vmem>>, vector<512x128xbf16>
    %cst_51 = arith.constant dense<0.000000e+00> : vector<8x128xf32>
    %99 = tpu.matmul %97, %98, %cst_51 {dimension_numbers = #tpu.dot_dimension_numbers<[1], [0], [0], [1], [0, 0, 1, 1], [], []>} : vector<8x512xbf16>, vector<512x128xbf16>, vector<8x128xf32> -> vector<8x128xf32>
    %c0_52 = arith.constant 0 : index
    %c0_53 = arith.constant 0 : index
    %100 = vector.load %arg17[%c0_52, %c0_53] : memref<1x128xf32, #tpu.memory_space<vmem>>, vector<1x128xf32>
    %101 = vector.broadcast %100 : vector<1x128xf32> to vector<8x128xf32>
    %102 = arith.addf %99, %101 : vector<8x128xf32>
    %c0_54 = arith.constant 0 : index
    %c0_55 = arith.constant 0 : index
    %103 = vector.load %arg18[%c0_54, %c0_55] : memref<8x128xf32, #tpu.memory_space<vmem>>, vector<8x128xf32>
    tpu.vector_store %arg18[%c0_54, %c0_55], %102 {strides = array<i32>} : memref<8x128xf32, #tpu.memory_space<vmem>>, vector<8x128xf32>,
    return
  }
  func.func @transform_0(%arg0: i32) -> (i32, i32) {
    %c0_i32 = arith.constant 0 : i32
    %c0_i32_0 = arith.constant 0 : i32
    return %arg0, %c0_i32 : i32, i32
  }
  func.func @transform_1(%arg0: i32) -> (i32, i32) {
    %c0_i32 = arith.constant 0 : i32
    %c0_i32_0 = arith.constant 0 : i32
    return %arg0, %c0_i32 : i32, i32
  }
  func.func @transform_2(%arg0: i32) -> (i32, i32) {
    %c0_i32 = arith.constant 0 : i32
    %c0_i32_0 = arith.constant 0 : i32
    %c0_i32_1 = arith.constant 0 : i32
    return %c0_i32, %c0_i32_0 : i32, i32
  }
  func.func @transform_3(%arg0: i32) -> (i32, i32) {
    %c0_i32 = arith.constant 0 : i32
    %c0_i32_0 = arith.constant 0 : i32
    %c0_i32_1 = arith.constant 0 : i32
    return %c0_i32, %c0_i32_0 : i32, i32
  }
  func.func @transform_4(%arg0: i32) -> (i32, i32) {
    %c0_i32 = arith.constant 0 : i32
    %c0_i32_0 = arith.constant 0 : i32
    %c0_i32_1 = arith.constant 0 : i32
    return %c0_i32, %c0_i32_0 : i32, i32
  }
  func.func @transform_5(%arg0: i32) -> (i32, i32) {
    %c0_i32 = arith.constant 0 : i32
    %c0_i32_0 = arith.constant 0 : i32
    %c0_i32_1 = arith.constant 0 : i32
    return %c0_i32, %c0_i32_0 : i32, i32
  }
  func.func @transform_6(%arg0: i32) -> (i32, i32) {
    %c0_i32 = arith.constant 0 : i32
    %c0_i32_0 = arith.constant 0 : i32
    %c0_i32_1 = arith.constant 0 : i32
    return %c0_i32, %c0_i32_0 : i32, i32
  }
  func.func @transform_7(%arg0: i32) -> (i32, i32) {
    %c0_i32 = arith.constant 0 : i32
    %c0_i32_0 = arith.constant 0 : i32
    %c0_i32_1 = arith.constant 0 : i32
    return %c0_i32, %c0_i32_0 : i32, i32
  }
  func.func @transform_8(%arg0: i32) -> (i32, i32) {
    %c0_i32 = arith.constant 0 : i32
    %c0_i32_0 = arith.constant 0 : i32
    %c0_i32_1 = arith.constant 0 : i32
    return %c0_i32, %c0_i32_0 : i32, i32
  }
  func.func @transform_9(%arg0: i32) -> (i32, i32) {
    %c0_i32 = arith.constant 0 : i32
    %c0_i32_0 = arith.constant 0 : i32
    %c0_i32_1 = arith.constant 0 : i32
    return %c0_i32, %c0_i32_0 : i32, i32
  }
  func.func @transform_10(%arg0: i32) -> (i32, i32) {
    %c0_i32 = arith.constant 0 : i32
    %c0_i32_0 = arith.constant 0 : i32
    %c0_i32_1 = arith.constant 0 : i32
    return %c0_i32, %c0_i32_0 : i32, i32
  }
  func.func @transform_11(%arg0: i32) -> (i32, i32) {
    %c0_i32 = arith.constant 0 : i32
    %c0_i32_0 = arith.constant 0 : i32
    %c0_i32_1 = arith.constant 0 : i32
    return %c0_i32, %c0_i32_0 : i32, i32
  }
  func.func @transform_12(%arg0: i32) -> (i32, i32) {
    %c0_i32 = arith.constant 0 : i32
    %c0_i32_0 = arith.constant 0 : i32
    %c0_i32_1 = arith.constant 0 : i32
    return %c0_i32, %c0_i32_0 : i32, i32
  }
  func.func @transform_13(%arg0: i32) -> (i32, i32) {
    %c0_i32 = arith.constant 0 : i32
    %c0_i32_0 = arith.constant 0 : i32
    %c0_i32_1 = arith.constant 0 : i32
    return %c0_i32, %c0_i32_0 : i32, i32
  }
  func.func @transform_14(%arg0: i32) -> (i32, i32) {
    %c0_i32 = arith.constant 0 : i32
    %c0_i32_0 = arith.constant 0 : i32
    %c0_i32_1 = arith.constant 0 : i32
    return %c0_i32, %c0_i32_0 : i32, i32
  }
  func.func @transform_15(%arg0: i32) -> (i32, i32) {
    %c0_i32 = arith.constant 0 : i32
    %c0_i32_0 = arith.constant 0 : i32
    %c0_i32_1 = arith.constant 0 : i32
    return %c0_i32, %c0_i32_0 : i32, i32
  }
  func.func @transform_16(%arg0: i32) -> (i32, i32) {
    %c0_i32 = arith.constant 0 : i32
    %c0_i32_0 = arith.constant 0 : i32
    %c0_i32_1 = arith.constant 0 : i32
    return %c0_i32, %c0_i32_0 : i32, i32
  }
  func.func @transform_17(%arg0: i32) -> (i32, i32) {
    %c0_i32 = arith.constant 0 : i32
    %c0_i32_0 = arith.constant 0 : i32
    return %arg0, %c0_i32 : i32, i32
  }
}

</mosaic_0001>

<bundles_post_ra>
// kernel: tpu_custom_call.1
= control target key start
LH: loop header
LB: loop body
LE: loop exit
PB: predicated region body
PF: predicated region fallthrough
CT: control target
= control target key end

     0   :  { %s5867_s0 = inlined_call_operand.vmem [shape: f32[8,1], index: 0, kind: input, shape index: {}]   ;;  %s5868_s1 = inlined_call_operand.vmem [shape: bf16[8,16], index: 1, kind: input, shape index: {}]   ;;  %s5869_s2 = inlined_call_operand.hbm [shape: f32[1,16], index: 2, kind: input, shape index: {}]   ;;  %s5870_s3 = inlined_call_operand.hbm [shape: f32[1,16], index: 3, kind: input, shape index: {}]   ;;  %s5871_s4 = inlined_call_operand.vmem [shape: f32[16,32], index: 4, kind: input, shape index: {}]   ;;  %s5872_s5 = inlined_call_operand.vmem [shape: f32[1,32], index: 5, kind: input, shape index: {}]   ;;  %s5873_s6 = inlined_call_operand.hbm [shape: bf16[16,512], index: 6, kind: input, shape index: {}]   ;;  %s5874_s7 = inlined_call_operand.hbm [shape: bf16[32,512], index: 7, kind: input, shape index: {}]   ;;  %s5875_s8 = inlined_call_operand.vmem [shape: f32[1,512], index: 8, kind: input, shape index: {}]   ;;  %s5876_s9 = inlined_call_operand.hbm [shape: bf16[512,512], index: 9, kind: input, shape index: {}]   ;;  %s5877_s10 = inlined_call_operand.vmem [shape: f32[1,512], index: 10, kind: input, shape index: {}]   ;;  %s5878_s11 = inlined_call_operand.hbm [shape: bf16[512,512], index: 11, kind: input, shape index: {}]   ;;  %s5879_s12 = inlined_call_operand.vmem [shape: f32[1,512], index: 12, kind: input, shape index: {}]   ;;  %s5880_s13 = inlined_call_operand.hbm [shape: bf16[512,512], index: 13, kind: input, shape index: {}]   ;;  %s5881_s14 = inlined_call_operand.vmem [shape: f32[1,512], index: 14, kind: input, shape index: {}]   ;;  %s5882_s15 = inlined_call_operand.hbm [shape: bf16[512,128], index: 15, kind: input, shape index: {}]   ;;  %s5883_s16 = inlined_call_operand.vmem [shape: f32[1,128], index: 16, kind: input, shape index: {}]   ;;  %s5884_s17 = inlined_call_operand.hbm [shape: f32[8,128], index: 17, kind: output, shape index: {}]  }
   0x1   :  { %5885 = sst [smem:[#allocation23_spill]] %s5867_s0 }
   0x2   :  { %5886 = sst [smem:[#allocation24_spill]] %s5868_s1 }
   0x3   :  { %22 = vsyncpa [#allocation3], 0 }
   0x4   :  { %23 = vsyncpa [#allocation6], 0 }
   0x5   :  { %24 = vsyncpa [#allocation9], 0 }
   0x6   :  { %25 = vsyncpa [#allocation12], 0 }
   0x7   :  { %26 = vsyncpa [#allocation15], 0 }
   0x8   :  { %27 = vsyncpa [#allocation4], 0  ;;  %s5506_s24 = smov [#allocation5]   ;;  %s5296_s28 = scalar_lea.hbm %s5870_s3, 16 }
   0x9   :  { %s48_s25 = sshll.u32 %s5506_s24, 4  ;;  %p5297_p0 = scmp.ne.s32.totalorder %s5870_s3, %s5296_s28  ;;  %s49_s25 = int_to_ptr.vmem [resolvable:$true] %s48_s25 }
   0xa   :  { %p5300_p1 = scmp.lt.u32.totalorder %s5296_s28, %s5870_s3 }
   0xc   :  { %p5302_p2 = pnand %p5300_p1, %p5297_p0 }
   0xe   :  { %5305 = shalt.err (!%p5302_p2)
}
   0xf   :  { %s5306_s19 = scalar_lea.vmem %s49_s25, 16  ;;  %s5310_s1 = scalar_lea.vmem %s49_s25, 32 }
  0x10   :  { %p5307_p3 = scmp.ne.s32.totalorder %s49_s25, %s5306_s19  ;;  %p5311_p4 = scmp.lt.s32.totalorder %s49_s25, %s49_s25 }
  0x11   :  { %p5312_p5 = scmp.lt.s32.totalorder %s5310_s1, %s5306_s19 }
  0x13   :  { %p5313_p6 = por %p5312_p5, %p5311_p4 }
  0x15   :  { %p5314_p7 = pnand %p5313_p6, %p5307_p3 }
  0x17   :  { %5317 = shalt.err (!%p5314_p7)
}
  0x18   :  { %51 = dma.hbm_to_vmem [thread:$0]  %s5870_s3, 16, %s49_s25, [#allocation6]  }
  0x19   :  { %s5507_s22 = smov [#allocation8]   ;;  %s5508_s24 = smov [#allocation11]  }
  0x1a   :  { %s73_s23 = sshll.u32 %s5507_s22, 4  ;;  %s101_s26 = sshll.u32 %s5508_s24, 4  ;;  %s74_s23 = int_to_ptr.vmem [resolvable:$true] %s73_s23  ;;  %s102_s26 = int_to_ptr.vmem [resolvable:$true] %s101_s26 }
  0x1b   :  { %s5318_s29 = scalar_lea.hbm %s5874_s7, 1024 }
  0x1c   :  { %p5319_p8 = scmp.ne.s32.totalorder %s5874_s7, %s5318_s29  ;;  %p5322_p9 = scmp.lt.u32.totalorder %s5318_s29, %s5874_s7 }
  0x1e   :  { %p5324_p10 = pnand %p5322_p9, %p5319_p8 }
  0x20   :  { %5327 = shalt.err (!%p5324_p10)
}
  0x21   :  { %s5328_s3 = scalar_lea.vmem %s74_s23, 1024  ;;  %p5333_p12 = scmp.lt.s32.totalorder %s74_s23, %s74_s23 }
  0x22   :  { %p5329_p11 = scmp.ne.s32.totalorder %s74_s23, %s5328_s3  ;;  %p5334_p13 = scmp.lt.s32.totalorder %s5328_s3, %s5328_s3 }
  0x24   :  { %p5335_p0 = por %p5334_p13, %p5333_p12 }
  0x26   :  { %p5336_p1 = pnand %p5335_p0, %p5329_p11 }
  0x28   :  { %5339 = shalt.err (!%p5336_p1)
}
  0x29   :  { %s5509_s25 = smov 256   ;;  %s5510_s1 = smov 16  }
  0x2a   :  { %79 = dma.hbm_to_vmem [thread:$0]  %s5874_s7, 1024, %s74_s23, [#allocation9], %s5509_s25, %s5509_s25, %s5510_s1  }
  0x2b   :  { %s5340_s27 = scalar_lea.hbm %s5878_s11, 16384 }
  0x2c   :  { %p5341_p2 = scmp.ne.s32.totalorder %s5878_s11, %s5340_s27  ;;  %p5344_p3 = scmp.lt.u32.totalorder %s5340_s27, %s5878_s11 }
  0x2e   :  { %p5346_p4 = pnand %p5344_p3, %p5341_p2 }
  0x30   :  { %5349 = shalt.err (!%p5346_p4)
}
  0x31   :  { %s5350_s18 = scalar_lea.vmem %s102_s26, 16384  ;;  %p5355_p6 = scmp.lt.s32.totalorder %s102_s26, %s102_s26 }
  0x32   :  { %p5351_p5 = scmp.ne.s32.totalorder %s102_s26, %s5350_s18  ;;  %p5356_p7 = scmp.lt.s32.totalorder %s5350_s18, %s5350_s18 }
  0x34   :  { %p5357_p8 = por %p5356_p7, %p5355_p6 }
  0x36   :  { %p5358_p9 = pnand %p5357_p8, %p5351_p5 }
  0x38   :  { %5361 = shalt.err (!%p5358_p9)
}
  0x39   :  { %107 = dma.hbm_to_vmem [thread:$0]  %s5878_s11, 16384, %s102_s26, [#allocation12], %s5509_s25, %s5509_s25, %s5510_s1  }
  0x3a   :  { %s5511_s19 = smov [#allocation2]   ;;  %s5512_s20 = smov [#allocation7]  }
  0x3b   :  { %s38_s3 = sshll.u32 %s5511_s19, 4  ;;  %s61_s21 = sshll.u32 %s5512_s20, 4  ;;  %s39_s3 = int_to_ptr.vmem [resolvable:$true] %s38_s3  ;;  %s62_s21 = int_to_ptr.vmem [resolvable:$true] %s61_s21 }
  0x3c   :  { %s5362_s27 = scalar_lea.hbm %s5869_s2, 16 }
  0x3d   :  { %p5363_p10 = scmp.ne.s32.totalorder %s5869_s2, %s5362_s27  ;;  %p5366_p11 = scmp.lt.u32.totalorder %s5362_s27, %s5869_s2 }
  0x3f   :  { %p5368_p12 = pnand %p5366_p11, %p5363_p10 }
  0x41   :  { %5371 = shalt.err (!%p5368_p12)
}
  0x42   :  { %s5372_s11 = scalar_lea.vmem %s39_s3, 16  ;;  %s5376_s26 = scalar_lea.vmem %s39_s3, 32 }
  0x43   :  { %p5373_p13 = scmp.ne.s32.totalorder %s39_s3, %s5372_s11  ;;  %p5377_p0 = scmp.lt.s32.totalorder %s39_s3, %s39_s3 }
  0x44   :  { %p5378_p1 = scmp.lt.s32.totalorder %s5376_s26, %s5372_s11 }
  0x46   :  { %p5379_p2 = por %p5378_p1, %p5377_p0 }
  0x48   :  { %p5380_p3 = pnand %p5379_p2, %p5373_p13 }
  0x4a   :  { %5383 = shalt.err (!%p5380_p3)
}
  0x4b   :  { %41 = dma.hbm_to_vmem [thread:$0]  %s5869_s2, 16, %s39_s3, [#allocation3]  }
  0x4c   :  { %s5384_s20 = scalar_lea.hbm %s5873_s6, 512 }
  0x4d   :  { %p5385_p4 = scmp.ne.s32.totalorder %s5873_s6, %s5384_s20  ;;  %p5388_p5 = scmp.lt.u32.totalorder %s5384_s20, %s5873_s6 }
  0x4f   :  { %p5390_p6 = pnand %p5388_p5, %p5385_p4 }
  0x51   :  { %5393 = shalt.err (!%p5390_p6)
}
  0x52   :  { %s5394_s29 = scalar_lea.vmem %s62_s21, 512  ;;  %p5399_p8 = scmp.lt.s32.totalorder %s62_s21, %s62_s21 }
  0x53   :  { %p5395_p7 = scmp.ne.s32.totalorder %s62_s21, %s5394_s29  ;;  %p5400_p9 = scmp.lt.s32.totalorder %s5394_s29, %s5394_s29 }
  0x55   :  { %p5401_p10 = por %p5400_p9, %p5399_p8 }
  0x57   :  { %p5402_p11 = pnand %p5401_p10, %p5395_p7 }
  0x59   :  { %5405 = shalt.err (!%p5402_p11)
}
  0x5a   :  { %67 = dma.hbm_to_vmem [thread:$0]  %s5873_s6, 512, %s62_s21, [#allocation6], %s5509_s25, %s5509_s25, %s5510_s1  }
  0x5b   :  { %s5513_s0 = smov [#allocation10]   ;;  %s5514_s11 = smov [#allocation13]  }
  0x5c   :  { %s87_s30 = sshll.u32 %s5513_s0, 4  ;;  %s115_s26 = sshll.u32 %s5514_s11, 4  ;;  %s88_s30 = int_to_ptr.vmem [resolvable:$true] %s87_s30  ;;  %s116_s26 = int_to_ptr.vmem [resolvable:$true] %s115_s26 }
  0x5d   :  { %s5406_s23 = scalar_lea.hbm %s5876_s9, 16384 }
  0x5e   :  { %p5407_p12 = scmp.ne.s32.totalorder %s5876_s9, %s5406_s23  ;;  %p5410_p13 = scmp.lt.u32.totalorder %s5406_s23, %s5876_s9 }
  0x60   :  { %p5412_p0 = pnand %p5410_p13, %p5407_p12 }
  0x62   :  { %5415 = shalt.err (!%p5412_p0)
}
  0x63   :  { %s5416_s6 = scalar_lea.vmem %s88_s30, 16384  ;;  %p5421_p2 = scmp.lt.s32.totalorder %s88_s30, %s88_s30 }
  0x64   :  { %p5417_p1 = scmp.ne.s32.totalorder %s88_s30, %s5416_s6  ;;  %p5422_p3 = scmp.lt.s32.totalorder %s5416_s6, %s5416_s6 }
  0x66   :  { %p5423_p4 = por %p5422_p3, %p5421_p2 }
  0x68   :  { %p5424_p5 = pnand %p5423_p4, %p5417_p1 }
  0x6a   :  { %5427 = shalt.err (!%p5424_p5)
}
  0x6b   :  { %93 = dma.hbm_to_vmem [thread:$0]  %s5876_s9, 16384, %s88_s30, [#allocation9], %s5509_s25, %s5509_s25, %s5510_s1  }
  0x6c   :  { %s5428_s2 = scalar_lea.hbm %s5880_s13, 16384 }
  0x6d   :  { %p5429_p6 = scmp.ne.s32.totalorder %s5880_s13, %s5428_s2  ;;  %p5432_p7 = scmp.lt.u32.totalorder %s5428_s2, %s5880_s13 }
  0x6f   :  { %p5434_p8 = pnand %p5432_p7, %p5429_p6 }
  0x71   :  { %5437 = shalt.err (!%p5434_p8)
}
  0x72   :  { %s5438_s7 = scalar_lea.vmem %s116_s26, 16384  ;;  %p5443_p10 = scmp.lt.s32.totalorder %s116_s26, %s116_s26 }
  0x73   :  { %p5439_p9 = scmp.ne.s32.totalorder %s116_s26, %s5438_s7  ;;  %p5444_p11 = scmp.lt.s32.totalorder %s5438_s7, %s5438_s7 }
  0x75   :  { %p5445_p12 = por %p5444_p11, %p5443_p10 }
  0x77   :  { %p5446_p13 = pnand %p5445_p12, %p5439_p9 }
  0x79   :  { %5449 = shalt.err (!%p5446_p13)
}
  0x7a   :  { %121 = dma.hbm_to_vmem [thread:$0]  %s5880_s13, 16384, %s116_s26, [#allocation12], %s5509_s25, %s5509_s25, %s5510_s1  }
  0x7b   :  { %s5515_s23 = smov [#allocation14]   ;;  %s5450_s24 = scalar_lea.hbm %s5882_s15, 4096 }
  0x7c   :  { %s129_s19 = sshll.u32 %s5515_s23, 4  ;;  %p5451_p0 = scmp.ne.s32.totalorder %s5882_s15, %s5450_s24  ;;  %s130_s19 = int_to_ptr.vmem [resolvable:$true] %s129_s19 }
  0x7d   :  { %p5454_p1 = scmp.lt.u32.totalorder %s5450_s24, %s5882_s15 }
  0x7f   :  { %p5456_p2 = pnand %p5454_p1, %p5451_p0 }
  0x81   :  { %5459 = shalt.err (!%p5456_p2)
}
  0x82   :  { %s5460_s29 = scalar_lea.vmem %s130_s19, 4096  ;;  %p5465_p4 = scmp.lt.s32.totalorder %s130_s19, %s130_s19 }
  0x83   :  { %p5461_p3 = scmp.ne.s32.totalorder %s130_s19, %s5460_s29  ;;  %p5466_p5 = scmp.lt.s32.totalorder %s5460_s29, %s5460_s29 }
  0x85   :  { %p5467_p6 = por %p5466_p5, %p5465_p4 }
  0x87   :  { %p5468_p7 = pnand %p5467_p6, %p5461_p3 }
  0x89   :  { %5471 = shalt.err (!%p5468_p7)
}
  0x8a   :  { %s5516_s13 = smov 64   ;;  %s5517_s25 = smov 4  }
  0x8b   :  { %135 = dma.hbm_to_vmem [thread:$0]  %s5882_s15, 4096, %s130_s19, [#allocation15], %s5516_s13, %s5516_s13, %s5517_s25  }
  0x8c   :  { %5494 = dma.done.wait [#allocation3], 16  }
  0x8d   :  { %5495 = vsyncadd [#allocation3], 4294967280 }
  0x8e   :  { %5496 = dma.done.wait [#allocation6], 528  }
  0x8f   :  { %5497 = vsyncadd [#allocation6], 4294966768 }
  0x90   :  { %5498 = dma.done.wait [#allocation9], 17408  }
  0x91   :  { %5499 = vsyncadd [#allocation9], 4294949888 }
  0x92   :  { %5500 = dma.done.wait [#allocation12], 32768  }
  0x93   :  { %5501 = vsyncadd [#allocation12], 4294934528 }
  0x94   :  { %5502 = dma.done.wait [#allocation15], 4096  }
  0x95   :  { %5503 = vsyncadd [#allocation15], 4294963200  ;;  %v5518_v0 = vmov 0   ;;  %s5887_s0 = sld [smem:[#allocation23_spill]]  ;;  %v288_v2 = vld [vmem:[%s5871_s4] sm:$0xff]  ;;  %v289_v3 = vld [vmem:[%s5871_s4 + $0x8] sm:$0xff] }
  0x96   :  { %4597 = vset.pattern.permute.xlu0 %v5518_v0  ;;  %470 = vmatprep.mubr.bf16.mxu1 %v5518_v0  ;;  %v5519_v4 = vmov 0.0|0.0   ;;  %v4532_v5 = vpack.c.bf16 %v289_v3, %v288_v2  ;;  %vm5520_vm0 = vmmov 0   ;;  %v5521_v6 = vmov 0.0   ;;  %v4036_v7 = vld [vmem:[#allocation2] ss:$0 sm:$0xff]  ;;  %s5888_s23 = sld [smem:[#allocation24_spill]] }
  0x97   :  { %4531 = vmatprep.subr.bf16.mxu0 %v5519_v4  ;;  %4528 = vmatprep.mubr.msk.f32.mxu0 %vm5520_vm0, %v5521_v6  ;;  %v4037_v8 = vld [vmem:[#allocation5] ss:$0 sm:$0xff]  ;;  %v5522_v23 = vmov 2102212464   ;;  %v5523_v25 = vmov 920167782  }
  0x98   :  { %4533 = vmatpush3.bf16.msra.mxu0 %v4532_v5  ;;  %v5524_v28 = vmov 683565275   ;;  %v5525_v30 = vmov 2475754826   ;;  %v5526_v33 = vmov 1326507024  }
  0x99   :  { %v5527_v36 = vmov 2131351028   ;;  %vm297_vm13 = vcmask 130048   ;;  %vm434_vm15 = vcmask 261120   ;;  %s5528_s27 = smov [#allocation16]  }
  0x9a   :  { %s4023_s28 = sshll.u32 %s5528_s27, 4  ;;  %s4024_s28 = int_to_ptr.vmem [resolvable:$true] %s4023_s28 }
  0x9b   :  { %v163_v1 = vld [vmem:[%s5887_s0] sm:$0xff]  ;;  %s5472_s29 = scalar_lea.vmem %s4024_s28, 128  ;;  %p5477_p9 = scmp.lt.s32.totalorder %s4024_s28, %s4024_s28 }
  0x9c   :  { %167 = vperm.xlu0 %4597, %v163_v1   ;;  %p5473_p8 = scmp.ne.s32.totalorder %s4024_s28, %s5472_s29  ;;  %p5478_p10 = scmp.lt.s32.totalorder %s5472_s29, %s5472_s29 }
  0x9e   :  { %p5479_p11 = por %p5478_p10, %p5477_p9 }
  0xa0   :  { %p5480_p12 = pnand %p5479_p11, %p5473_p8 }
 0x11b   :  { %v168_v9 = vpop.permute.xlu0 %167 }
 0x11c   :  { %v176_v10 = vmul.f32 %v4036_v7, %v168_v9 }
 0x11e   :  { %v5741_v11 = vsub.f32 %v176_v10, %v4037_v8 }
 0x120   :  { %v188_v12 = vand.u32 2139095040, %v5741_v11  ;;  %v185_v13 = vand.u32 2147483647, %v5741_v11  ;;  %vm187_vm8 = vcmp.lt.s32.totalorder %v5741_v11, 0  ;;  %vm277_vm14 = vweird.f32 %v5741_v11 }
 0x122   :  { %v189_v14 = vshrl.u32 %v188_v12, 23  ;;  %v192_v15 = vand.u32 8388607, %v185_v13  ;;  %vm186_vm9 = vcmp.le.f32.partialorder %v185_v13, 0.7853982 }
 0x124   :  { %v4038_v16 = vadd.s32 4294967169, %v189_v14  ;;  %v193_v18 = vor.u32 8388608, %v192_v15 }
 0x126   :  { %v195_v17 = vadd.s32 1, %v4038_v16  ;;  %v233_v27 = vshll.u32 %v193_v18, 8 }
 0x128   :  { %vm196_vm1 = vcmp.gt.s32.totalorder %v195_v17, 0 }
 0x129   :  { %v197_v19 = vsel %vm196_vm1, %v195_v17, 0 }
 0x12a   :  { %v198_v20 = vshrl.u32 %v197_v19, 5  ;;  %v199_v21 = vand.u32 31, %v197_v19 }
 0x12c   :  { %v200_v22 = vsub.s32 32, %v199_v21  ;;  %v211_v24 = vshll.u32 %v5522_v23, %v199_v21  ;;  %v214_v26 = vshll.u32 %v5523_v25, %v199_v21  ;;  %vm220_vm2 = vcmp.lt.s32.totalorder %v198_v20, 4 }
 0x12d   :  { %v202_v29 = vshll.u32 %v5524_v28, %v199_v21  ;;  %v205_v31 = vshll.u32 %v5525_v30, %v199_v21  ;;  %vm217_vm3 = vcmp.lt.s32.totalorder %v198_v20, 1  ;;  %v208_v37 = vshll.u32 %v5527_v36, %v199_v21 }
 0x12e   :  { %v212_v32 = vshrl.u32 %v5523_v25, %v200_v22  ;;  %v215_v34 = vshrl.u32 %v5526_v33, %v200_v22  ;;  %v203_v35 = vshrl.u32 %v5525_v30, %v200_v22  ;;  %v206_v38 = vshrl.u32 %v5527_v36, %v200_v22 }
 0x12f   :  { %v209_v39 = vshrl.u32 %v5522_v23, %v200_v22  ;;  %vm218_vm4 = vcmp.lt.s32.totalorder %v198_v20, 2  ;;  %vm219_vm5 = vcmp.lt.s32.totalorder %v198_v20, 3  ;;  %v201_v47 = vshrl.u32 %v5524_v28, %v200_v22 }
 0x130   :  { %v213_v40 = vor.u32 %v212_v32, %v211_v24  ;;  %v216_v41 = vor.u32 %v215_v34, %v214_v26  ;;  %v204_v42 = vor.u32 %v203_v35, %v202_v29  ;;  %v207_v43 = vor.u32 %v206_v38, %v205_v31 }
 0x131   :  { %v210_v44 = vor.u32 %v209_v39, %v208_v37 }
 0x132   :  { %v226_v45 = vsel %vm220_vm2, %v213_v40, 920167782  ;;  %v230_v46 = vsel %vm220_vm2, %v216_v41, 1326507024  ;;  %v225_v49 = vsel %vm217_vm3, %v204_v42, %v207_v43  ;;  %v221_v52 = vsel %vm217_vm3, %v201_v47, %v204_v42  ;;  %v4603_v41 = vld [vmem:[#allocation8 + $0xc] ss:$16 sps:$4 sm:$0xff]  }
 0x133   :  { %v222_v48 = vsel %vm220_vm2, %v210_v44, 2102212464  ;;  %v227_v50 = vsel %vm219_vm5, %v210_v44, %v226_v45  ;;  %v229_v51 = vsel %vm217_vm3, %v207_v43, %v210_v44  ;;  %v231_v55 = vsel %vm219_vm5, %v213_v40, %v230_v46  ;;  %v4598_v40 = vld [vmem:[#allocation8 + $0x4] ss:$16 sps:$4 sm:$0xff]   ;;  %v4600_v42 = vld [vmem:[#allocation8] ss:$16 sps:$4 sm:$0xff]   ;;  %479 = vmatprep.subr.bf16.mxu0 %v4603_v41 }
 0x134   :  { %v223_v53 = vsel %vm219_vm5, %v207_v43, %v222_v48  ;;  %v228_v54 = vsel %vm218_vm4, %v225_v49, %v227_v50  ;;  %v232_v56 = vsel %vm218_vm4, %v229_v51, %v231_v55  ;;  %v4601_v43 = vld [vmem:[#allocation8 + $0x8] ss:$16 sps:$4 sm:$0xff]   ;;  %438 = vmatprep.subr.bf16.mxu1 %v4598_v40  ;;  %v4604_v44 = vld [vmem:[#allocation8 + $0x24] ss:$16 sps:$4 sm:$0xff]   ;;  %v4609_v45 = vld [vmem:[#allocation8 + $0x2c] ss:$16 sps:$4 sm:$0xff]  }
 0x135   :  { %v5758_v57 = vmul.u32.u64.low %v233_v27, %v228_v54  ;;  %v5759_v58 = vmul.u32.u64.high %v233_v27, %v228_v54, %v5758_v57  ;;  %v5761_v59 = vmul.u32.u64.low %v233_v27, %v232_v56  ;;  %v5762_v60 = vmul.u32.u64.high %v233_v27, %v232_v56, %v5761_v59  ;;  %439 = vmatpush1.bf16.msra.mxu1 %v4600_v42  ;;  %v4606_v46 = vld [vmem:[#allocation8 + $0x20] ss:$16 sps:$4 sm:$0xff]   ;;  %v4607_v47 = vld [vmem:[#allocation8 + $0x28] ss:$16 sps:$4 sm:$0xff]   ;;  %v4615_v48 = vld [vmem:[#allocation7 + $0xc] ss:$16 sps:$4 sm:$0xff]  }
 0x136   :  { %v224_v61 = vsel %vm218_vm4, %v221_v52, %v223_v53  ;;  %440 = vmatprep.subr.bf16.mxu1 %v4604_v44  ;;  %v4042_v49 = vld [vmem:[%s5872_s5] ss:$0 sm:$0xff]  ;;  %v4675_v40 = vld [vmem:[#allocation10 + $0x12c] ss:$16 sps:$4 sm:$0xff]   ;;  %v4670_v41 = vld [vmem:[#allocation10 + $0x120] ss:$16 sps:$4 sm:$0xff]  }
 0x137   :  { %v243_v62 = vadd.s32 1, %v5759_v58  ;;  %v240_v63 = vmul.u32 %v233_v27, %v224_v61  ;;  %vm242_vm6 = vc.u32 %v5762_v60, %v5758_v57  ;;  %v241_v14 = vadd.s32 %v5758_v57, %v5762_v60  ;;  %v4673_v42 = vld [vmem:[#allocation10 + $0x128] ss:$16 sps:$4 sm:$0xff]   ;;  %v4681_v44 = vld [vmem:[#allocation10 + $0x14c] ss:$16 sps:$4 sm:$0xff]  }
 0x139   :  { %v244_v1 = vsel %vm242_vm6, %v243_v62, %v5759_v58  ;;  %441 = vmatpush1.bf16.msra.mxu1 %v4606_v46  ;;  %v4610_v62 = vld [vmem:[#allocation7] ss:$16 sps:$4 sm:$0xff]   ;;  %v4679_v46 = vld [vmem:[#allocation10 + $0x148] ss:$16 sps:$4 sm:$0xff]  }
 0x13a   :  { %v245_v2 = vadd.s32 %v244_v1, %v240_v63  ;;  %v4613_v63 = vld [vmem:[#allocation7 + $0x8] ss:$16 sps:$4 sm:$0xff]  }
 0x13c   :  { %v246_v3 = vadd.s32 536870912, %v245_v2 }
 0x13e   :  { %v247_v4 = vshrl.u32 %v246_v3, 30  ;;  %v4621_v3 = vld [vmem:[#allocation10 + $0xc] ss:$16 sps:$4 sm:$0xff]  }
 0x140   :  { %v248_v5 = vshll.u32 %v247_v4, 30  ;;  %v271_v28 = vsub.s32 4, %v247_v4 }
 0x142   :  { %v249_v6 = vsub.s32 %v245_v2, %v248_v5  ;;  %v272_v30 = vsel %vm187_vm8, %v271_v28, %v247_v4  ;;  %v4618_v2 = vld [vmem:[#allocation10 + $0x4] ss:$16 sps:$4 sm:$0xff]   ;;  %v4616_v5 = vld [vmem:[#allocation10] ss:$16 sps:$4 sm:$0xff]  }
 0x143   :  { %v274_v31 = vsel %vm186_vm9, 0, %v272_v30  ;;  %v380_v4 = vld [vmem:[%s5888_s23] sm:$0xf]  ;;  %v4652_v30 = vld [vmem:[#allocation10 + $0xc0] ss:$16 sps:$4 sm:$0xff]  }
 0x144   :  { %v251_v7 = vsub.s32 0, %v249_v6  ;;  %v278_v32 = vand.u32 3, %v274_v31  ;;  %v4654_v28 = vld [vmem:[#allocation10 + $0xc4] ss:$16 sps:$4 sm:$0xff]   ;;  %v4655_v31 = vld [vmem:[#allocation10 + $0xc8] ss:$16 sps:$4 sm:$0xff]  }
 0x146   :  { %v4039_v8 = vmin.u32 %v251_v7, %v249_v6  ;;  %vm283_vm10 = vcmp.eq.s32.totalorder %v278_v32, 2  ;;  %vm280_vm11 = vcmp.eq.s32.totalorder %v278_v32, 0  ;;  %vm279_vm12 = vcmp.lt.s32.totalorder %v278_v32, 2  ;;  %v4624_v7 = vld [vmem:[#allocation10 + $0x24] ss:$16 sps:$4 sm:$0xff]  }
 0x147   :  { %v4660_v32 = vld [vmem:[#allocation10 + $0xe4] ss:$16 sps:$4 sm:$0xff]  }
 0x148   :  { %v253_v9 = vclz %v4039_v8  ;;  %v4627_v8 = vld [vmem:[#allocation10 + $0x2c] ss:$16 sps:$4 sm:$0xff]  }
 0x14a   :  { %v4040_v10 = vadd.s32 4294967294, %v253_v9  ;;  %v4622_v9 = vld [vmem:[#allocation10 + $0x20] ss:$16 sps:$4 sm:$0xff]  }
 0x14c   :  { %vm4041_vm7 = vcmp.lt.s32.totalorder %v4040_v10, 0 }
 0x14d   :  { %v256_v12 = vsel %vm4041_vm7, 0, %v4040_v10  ;;  %v4625_v10 = vld [vmem:[#allocation10 + $0x28] ss:$16 sps:$4 sm:$0xff]  }
 0x14e   :  { %v257_v15 = vsub.s32 32, %v256_v12  ;;  %v261_v16 = vsub.s32 4294967266, %v256_v12  ;;  %v258_v17 = vshll.u32 %v249_v6, %v256_v12  ;;  %v4619_v6 = vld [vmem:[#allocation10 + $0x8] ss:$16 sps:$4 sm:$0xff]   ;;  %v4633_v12 = vld [vmem:[#allocation10 + $0x4c] ss:$16 sps:$4 sm:$0xff]  }
 0x150   :  { %v259_v18 = vshrl.u32 %v241_v14, %v257_v15  ;;  %v262_v19 = vadd.s32 127, %v261_v16  ;;  %v4628_v14 = vld [vmem:[#allocation10 + $0x40] ss:$16 sps:$4 sm:$0xff]   ;;  %v4631_v15 = vld [vmem:[#allocation10 + $0x48] ss:$16 sps:$4 sm:$0xff]  }
 0x151   :  { %v4634_v16 = vld [vmem:[#allocation10 + $0x60] ss:$16 sps:$4 sm:$0xff]  }
 0x152   :  { %v260_v20 = vor.u32 %v259_v18, %v258_v17  ;;  %v263_v21 = vshll.u32 %v262_v19, 23  ;;  %v4636_v17 = vld [vmem:[#allocation10 + $0x64] ss:$16 sps:$4 sm:$0xff]   ;;  %v4637_v18 = vld [vmem:[#allocation10 + $0x68] ss:$16 sps:$4 sm:$0xff]  }
 0x153   :  { %v4639_v19 = vld [vmem:[#allocation10 + $0x6c] ss:$16 sps:$4 sm:$0xff]  }
 0x154   :  { %v264_v22 = vor.u32 4788187, %v263_v21  ;;  %v267_v24 = vcvt.s32.f32 %v260_v20  ;;  %v4640_v20 = vld [vmem:[#allocation10 + $0x80] ss:$16 sps:$4 sm:$0xff]   ;;  %v4642_v21 = vld [vmem:[#allocation10 + $0x84] ss:$16 sps:$4 sm:$0xff]  }
 0x156   :  { %v265_v23 = vand.u32 2147483647, %v264_v22  ;;  %v4643_v22 = vld [vmem:[#allocation10 + $0x88] ss:$16 sps:$4 sm:$0xff]  }
 0x158   :  { %v268_v25 = vmul.f32 %v267_v24, %v265_v23  ;;  %v4645_v23 = vld [vmem:[#allocation10 + $0x8c] ss:$16 sps:$4 sm:$0xff]   ;;  %v4648_v24 = vld [vmem:[#allocation10 + $0xa4] ss:$16 sps:$4 sm:$0xff]  }
 0x15a   :  { %v269_v26 = vxor.u32 2147483648, %v268_v25 }
 0x15c   :  { %v270_v27 = vsel %vm187_vm8, %v269_v26, %v268_v25  ;;  %v4651_v25 = vld [vmem:[#allocation10 + $0xac] ss:$16 sps:$4 sm:$0xff]   ;;  %v4646_v26 = vld [vmem:[#allocation10 + $0xa0] ss:$16 sps:$4 sm:$0xff]  }
 0x15d   :  { %v273_v29 = vsel %vm186_vm9, %v5741_v11, %v270_v27  ;;  %v4612_v11 = vld [vmem:[#allocation7 + $0x4] ss:$16 sps:$4 sm:$0xff]   ;;  %v4649_v27 = vld [vmem:[#allocation10 + $0xa8] ss:$16 sps:$4 sm:$0xff]  }
 0x15e   :  { %5224 = vcosq.f32 %v273_v29  ;;  %543 = vmatprep.subr.bf16.mxu1 %v4612_v11  ;;  %v4687_v11 = vld [vmem:[#allocation10 + $0x16c] ss:$16 sps:$4 sm:$0xff]  }
 0x15f   :  { %5226 = vsinq.f32 %v273_v29  ;;  %v4657_v29 = vld [vmem:[#allocation10 + $0xcc] ss:$16 sps:$4 sm:$0xff]  }
 0x168   :  { %v5225_v33 = vpop.eup %5224 }
 0x169   :  { %v5227_v34 = vpop.eup %5226  ;;  %v284_v35 = vxor.u32 2147483648, %v5225_v33 }
 0x16a   :  { %v281_v36 = vxor.u32 2147483648, %v5227_v34 }
 0x16b   :  { %v285_v37 = vsel %vm283_vm10, %v284_v35, %v5227_v34  ;;  %v4658_v34 = vld [vmem:[#allocation10 + $0xe0] ss:$16 sps:$4 sm:$0xff]   ;;  %v4661_v35 = vld [vmem:[#allocation10 + $0xe8] ss:$16 sps:$4 sm:$0xff]  }
 0x16c   :  { %v282_v38 = vsel %vm280_vm11, %v5225_v33, %v281_v36  ;;  %v4663_v33 = vld [vmem:[#allocation10 + $0xec] ss:$16 sps:$4 sm:$0xff]   ;;  %v4666_v36 = vld [vmem:[#allocation10 + $0x104] ss:$16 sps:$4 sm:$0xff]  }
 0x16d   :  { %v286_v13 = vsel %vm279_vm12, %v282_v38, %v285_v37  ;;  %v4669_v37 = vld [vmem:[#allocation10 + $0x10c] ss:$16 sps:$4 sm:$0xff]   ;;  %v4664_v38 = vld [vmem:[#allocation10 + $0x100] ss:$16 sps:$4 sm:$0xff]  }
 0x16e   :  { %v287_v39 = vsel %vm277_vm14, nan, %v286_v13  ;;  %v4667_v13 = vld [vmem:[#allocation10 + $0x108] ss:$16 sps:$4 sm:$0xff]  }
 0x16f   :  { %4529 = vmatmul.mubr.msk.f32.vlgmr.msra.gmra.mrb[0].mxu0 %vm297_vm13, %v287_v39  ;;  %v4672_v39 = vld [vmem:[#allocation10 + $0x124] ss:$16 sps:$4 sm:$0xff]  }
 0x170   :  { %511 = vmatprep.mubr.bf16.mxu0 %v5518_v0  ;;  %480 = vmatpush1.bf16.msra.mxu0 %v4601_v43  ;;  %v4678_v43 = vld [vmem:[#allocation10 + $0x144] ss:$16 sps:$4 sm:$0xff]  }
 0x171   :  { %481 = vmatprep.subr.bf16.mxu0 %v4609_v45  ;;  %v4676_v45 = vld [vmem:[#allocation10 + $0x140] ss:$16 sps:$4 sm:$0xff]  }
 0x174   :  { %482 = vmatpush1.bf16.msra.mxu0 %v4607_v47  ;;  %v4684_v47 = vld [vmem:[#allocation10 + $0x164] ss:$16 sps:$4 sm:$0xff]  }
 0x175   :  { %584 = vmatprep.subr.bf16.mxu0 %v4615_v48  ;;  %v4682_v48 = vld [vmem:[#allocation10 + $0x160] ss:$16 sps:$4 sm:$0xff]  }
 0x242   :  { %v367_v50 = vpop.f32.mrb[0].mxu0 }
 0x243   :  { %v368_v51 = vadd.f32 %v4042_v49, %v367_v50  ;;  %v4530_v52 = vpop.f32.mrb[1].mxu0  ;;  %v4685_v49 = vld [vmem:[#allocation10 + $0x168] ss:$16 sps:$4 sm:$0xff]   ;;  %v4690_v50 = vld [vmem:[#allocation10 + $0x184] ss:$16 sps:$4 sm:$0xff]  }
 0x244   :  { %v4688_v52 = vld [vmem:[#allocation10 + $0x180] ss:$16 sps:$4 sm:$0xff]  }
 0x245   :  { %v371_v53 = vmin.f32 %v368_v51, 20.0 }
 0x247   :  { %v372_v54 = vmul.f32 1.442695, %v371_v53  ;;  %v4691_v53 = vld [vmem:[#allocation10 + $0x188] ss:$16 sps:$4 sm:$0xff]  }
 0x249   :  { %5228 = vpow2.f32 %v372_v54  ;;  %v4696_v54 = vld [vmem:[#allocation10 + $0x1a4] ss:$16 sps:$4 sm:$0xff]  }
 0x253   :  { %v5229_v55 = vpop.eup %5228 }
 0x254   :  { %v374_v56 = vadd.f32 2.0, %v5229_v55 }
 0x256   :  { %v375_v57 = vmul.f32 %v5229_v55, %v374_v56  ;;  %v4699_v55 = vld [vmem:[#allocation10 + $0x1ac] ss:$16 sps:$4 sm:$0xff]   ;;  %v4694_v56 = vld [vmem:[#allocation10 + $0x1a0] ss:$16 sps:$4 sm:$0xff]  }
 0x258   :  { %v376_v58 = vadd.f32 2.0, %v375_v57 }
 0x25a   :  { %5230 = vrcp.f32 %v376_v58  ;;  %v4702_v58 = vld [vmem:[#allocation10 + $0x1c4] ss:$16 sps:$4 sm:$0xff]  }
 0x264   :  { %v5231_v59 = vpop.eup %5230 }
 0x265   :  { %v378_v60 = vmul.f32 %v5231_v59, %v375_v57  ;;  %v4697_v57 = vld [vmem:[#allocation10 + $0x1a8] ss:$16 sps:$4 sm:$0xff]   ;;  %v4705_v59 = vld [vmem:[#allocation10 + $0x1cc] ss:$16 sps:$4 sm:$0xff]  }
 0x267   :  { %v379_v61 = vmul.f32 %v378_v60, %v368_v51  ;;  %v4693_v51 = vld [vmem:[#allocation10 + $0x18c] ss:$16 sps:$4 sm:$0xff]   ;;  %v4700_v60 = vld [vmem:[#allocation10 + $0x1c0] ss:$16 sps:$4 sm:$0xff]  }
 0x269   :  { %v385_v1 = vpack.c.bf16 %v379_v61, %v379_v61  ;;  %v4703_v61 = vld [vmem:[#allocation10 + $0x1c8] ss:$16 sps:$4 sm:$0xff]  }
 0x26b   :  { %4052 = vmatmul.mubr.msk.bf16.vlgmr.msra.gmra.mrb[0].mxu1 %vm434_vm15, %v385_v1  ;;  %4053 = vmatmul.mubr.msk.bf16.vlgmr.msra.gmra.mrb[4].mxu0 %vm434_vm15, %v385_v1  ;;  %v4706_v1 = vld [vmem:[#allocation10 + $0x1e0] ss:$16 sps:$4 sm:$0xff]  }
 0x26c   :  { %544 = vmatpush1.bf16.msra.mxu1 %v4610_v62  ;;  %585 = vmatpush1.bf16.msra.mxu0 %v4613_v63  ;;  %v4708_v62 = vld [vmem:[#allocation10 + $0x1e4] ss:$16 sps:$4 sm:$0xff]   ;;  %v4711_v63 = vld [vmem:[#allocation10 + $0x1ec] ss:$16 sps:$4 sm:$0xff]  }
 0x26d   :  { %575 = vmatprep.mubr.bf16.mxu1 %v5518_v0  ;;  %616 = vmatprep.mubr.bf16.mxu0 %v5518_v0  ;;  %v4630_v0 = vld [vmem:[#allocation10 + $0x44] ss:$16 sps:$4 sm:$0xff]  }
 0x26e   :  { %1481 = vmatprep.subr.bf16.mxu1 %v4618_v2  ;;  %1563 = vmatprep.subr.bf16.mxu0 %v4621_v3  ;;  %v4709_v2 = vld [vmem:[#allocation10 + $0x1e8] ss:$16 sps:$4 sm:$0xff]   ;;  %v4714_v3 = vld [vmem:[#allocation10 + $0x204] ss:$16 sps:$4 sm:$0xff]  }
 0x273   :  { %4058 = vmatmul.mubr.msk.bf16.vlgmr.msra.gmra.mrb[4].mxu1 %vm297_vm13, %v380_v4  ;;  %4059 = vmatmul.mubr.msk.bf16.vlgmr.msra.gmra.mrb[8].mxu0 %vm297_vm13, %v380_v4  ;;  %v4717_v4 = vld [vmem:[#allocation10 + $0x20c] ss:$16 sps:$4 sm:$0xff]  }
 0x274   :  { %1482 = vmatpush1.bf16.msra.mxu1 %v4616_v5  ;;  %1564 = vmatpush1.bf16.msra.mxu0 %v4619_v6  ;;  %v627_v5 = vlaneseq }
 0x275   :  { %1483 = vmatprep.subr.bf16.mxu1 %v4624_v7  ;;  %1565 = vmatprep.subr.bf16.mxu0 %v4627_v8 }
 0x276   :  { %v628_v6 = vshrl.u32 %v627_v5, 7  ;;  %v4715_v5 = vld [vmem:[#allocation10 + $0x208] ss:$16 sps:$4 sm:$0xff]  }
 0x278   :  { %1484 = vmatpush1.bf16.msra.mxu1 %v4622_v9  ;;  %1566 = vmatpush1.bf16.msra.mxu0 %v4625_v10 }
 0x279   :  { %1485 = vmatprep.subr.bf16.mxu1 %v4630_v0  ;;  %1567 = vmatprep.subr.bf16.mxu0 %v4633_v12 }
 0x27c   :  { %1486 = vmatpush1.bf16.msra.mxu1 %v4628_v14  ;;  %1568 = vmatpush1.bf16.msra.mxu0 %v4631_v15 }
 0x27d   :  { %1487 = vmatprep.subr.bf16.mxu1 %v4636_v17  ;;  %1569 = vmatprep.subr.bf16.mxu0 %v4639_v19  ;;  %v5788_v17 = vsub.s32 2, %v628_v6  ;;  %v5793_v19 = vsub.s32 1, %v628_v6 }
 0x280   :  { %1488 = vmatpush1.bf16.msra.mxu1 %v4634_v16  ;;  %1570 = vmatpush1.bf16.msra.mxu0 %v4637_v18  ;;  %v5786_v16 = vsub.s32 0, %v628_v6  ;;  %v625_v18 = vld [vmem:[%s5875_s8] sm:$0xf] }
 0x281   :  { %1489 = vmatprep.subr.bf16.mxu1 %v4642_v21  ;;  %1571 = vmatprep.subr.bf16.mxu0 %v4645_v23 }
 0x282   :  { %v630_v21 = vrot.slane %v625_v18, %v5786_v16 }
 0x284   :  { %1490 = vmatpush1.bf16.msra.mxu1 %v4640_v20  ;;  %1572 = vmatpush1.bf16.msra.mxu0 %v4643_v22  ;;  %v5795_v20 = vsub.s32 3, %v628_v6  ;;  %v638_v22 = vrot.slane %v625_v18, %v5788_v17 }
 0x285   :  { %1491 = vmatprep.subr.bf16.mxu1 %v4648_v24  ;;  %1573 = vmatprep.subr.bf16.mxu0 %v4651_v25  ;;  %v634_v25 = vrot.slane %v625_v18, %v5793_v19 }
 0x288   :  { %1492 = vmatpush1.bf16.msra.mxu1 %v4646_v26  ;;  %1574 = vmatpush1.bf16.msra.mxu0 %v4649_v27  ;;  %v642_v26 = vrot.slane %v625_v18, %v5795_v20  ;;  %v4727_v18 = vld [vmem:[#allocation10 + $0x248] ss:$16 sps:$4 sm:$0xff]  }
 0x289   :  { %1493 = vmatprep.subr.bf16.mxu1 %v4654_v28  ;;  %1575 = vmatprep.subr.bf16.mxu0 %v4657_v29 }
 0x28c   :  { %1494 = vmatpush1.bf16.msra.mxu1 %v4652_v30  ;;  %1576 = vmatpush1.bf16.msra.mxu0 %v4655_v31 }
 0x28d   :  { %1495 = vmatprep.subr.bf16.mxu1 %v4660_v32  ;;  %1577 = vmatprep.subr.bf16.mxu0 %v4663_v33 }
 0x290   :  { %1496 = vmatpush1.bf16.msra.mxu1 %v4658_v34  ;;  %1578 = vmatpush1.bf16.msra.mxu0 %v4661_v35 }
 0x291   :  { %1497 = vmatprep.subr.bf16.mxu1 %v4666_v36  ;;  %1579 = vmatprep.subr.bf16.mxu0 %v4669_v37 }
 0x294   :  { %1498 = vmatpush1.bf16.msra.mxu1 %v4664_v38  ;;  %1580 = vmatpush1.bf16.msra.mxu0 %v4667_v13 }
 0x295   :  { %1499 = vmatprep.subr.bf16.mxu1 %v4672_v39  ;;  %1581 = vmatprep.subr.bf16.mxu0 %v4675_v40 }
 0x298   :  { %1500 = vmatpush1.bf16.msra.mxu1 %v4670_v41  ;;  %1582 = vmatpush1.bf16.msra.mxu0 %v4673_v42 }
 0x299   :  { %1501 = vmatprep.subr.bf16.mxu1 %v4678_v43  ;;  %1583 = vmatprep.subr.bf16.mxu0 %v4681_v44 }
 0x29c   :  { %1502 = vmatpush1.bf16.msra.mxu1 %v4676_v45  ;;  %1584 = vmatpush1.bf16.msra.mxu0 %v4679_v46 }
 0x29d   :  { %1503 = vmatprep.subr.bf16.mxu1 %v4684_v47  ;;  %1585 = vmatprep.subr.bf16.mxu0 %v4687_v11 }
 0x2a0   :  { %1504 = vmatpush1.bf16.msra.mxu1 %v4682_v48  ;;  %1586 = vmatpush1.bf16.msra.mxu0 %v4685_v49 }
 0x2a1   :  { %1505 = vmatprep.subr.bf16.mxu1 %v4690_v50  ;;  %1587 = vmatprep.subr.bf16.mxu0 %v4693_v51 }
 0x2a4   :  { %1506 = vmatpush1.bf16.msra.mxu1 %v4688_v52  ;;  %1588 = vmatpush1.bf16.msra.mxu0 %v4691_v53 }
 0x2a5   :  { %1507 = vmatprep.subr.bf16.mxu1 %v4696_v54  ;;  %1589 = vmatprep.subr.bf16.mxu0 %v4699_v55 }
 0x2a8   :  { %1508 = vmatpush1.bf16.msra.mxu1 %v4694_v56  ;;  %1590 = vmatpush1.bf16.msra.mxu0 %v4697_v57 }
 0x2a9   :  { %1509 = vmatprep.subr.bf16.mxu1 %v4702_v58  ;;  %1591 = vmatprep.subr.bf16.mxu0 %v4705_v59 }
 0x2ac   :  { %1510 = vmatpush1.bf16.msra.mxu1 %v4700_v60  ;;  %1592 = vmatpush1.bf16.msra.mxu0 %v4703_v61 }
 0x2ad   :  { %1511 = vmatprep.subr.bf16.mxu1 %v4708_v62  ;;  %1593 = vmatprep.subr.bf16.mxu0 %v4711_v63 }
 0x2b0   :  { %1512 = vmatpush1.bf16.msra.mxu1 %v4706_v1  ;;  %1594 = vmatpush1.bf16.msra.mxu0 %v4709_v2 }
 0x2b1   :  { %1522 = vmatprep.subr.bf16.mxu1 %v4714_v3  ;;  %1604 = vmatprep.subr.bf16.mxu0 %v4717_v4  ;;  %v4712_v4 = vld [vmem:[#allocation10 + $0x200] ss:$16 sps:$4 sm:$0xff]  }
 0x33e   :  { %v472_v7 = vpop.f32.mrb[0].mxu1  ;;  %v513_v8 = vpop.f32.mrb[4].mxu0 }
 0x33f   :  { %v474_v9 = vpop.f32.mrb[1].mxu1  ;;  %v515_v10 = vpop.f32.mrb[5].mxu0 }
 0x340   :  { %v476_v0 = vpop.f32.mrb[2].mxu1  ;;  %v517_v12 = vpop.f32.mrb[6].mxu0 }
 0x341   :  { %v477_v14 = vpop.f32.mrb[3].mxu1  ;;  %v518_v15 = vpop.f32.mrb[7].mxu0  ;;  %v4721_v0 = vld [vmem:[#allocation10 + $0x228] ss:$16 sps:$4 sm:$0xff]   ;;  %v4726_v12 = vld [vmem:[#allocation10 + $0x244] ss:$16 sps:$4 sm:$0xff]  }
 0x342   :  { %v4729_v14 = vld [vmem:[#allocation10 + $0x24c] ss:$16 sps:$4 sm:$0xff]   ;;  %v4724_v15 = vld [vmem:[#allocation10 + $0x240] ss:$16 sps:$4 sm:$0xff]  }
 0x346   :  { %v577_v23 = vpop.f32.mrb[4].mxu1  ;;  %v618_v24 = vpop.f32.mrb[8].mxu0 }
 0x347   :  { %v578_v27 = vadd.f32 %v577_v23, %v472_v7  ;;  %v619_v28 = vadd.f32 %v618_v24, %v513_v8  ;;  %v579_v29 = vpop.f32.mrb[5].mxu1  ;;  %v620_v30 = vpop.f32.mrb[9].mxu0  ;;  %v4720_v7 = vld [vmem:[#allocation10 + $0x224] ss:$16 sps:$4 sm:$0xff]   ;;  %v4723_v8 = vld [vmem:[#allocation10 + $0x22c] ss:$16 sps:$4 sm:$0xff]  }
 0x348   :  { %v580_v31 = vadd.f32 %v579_v29, %v474_v9  ;;  %v621_v32 = vadd.f32 %v620_v30, %v515_v10  ;;  %v581_v33 = vpop.f32.mrb[6].mxu1  ;;  %v622_v34 = vpop.f32.mrb[10].mxu0  ;;  %v4718_v10 = vld [vmem:[#allocation10 + $0x220] ss:$16 sps:$4 sm:$0xff]   ;;  %v4739_v30 = vld [vmem:[#allocation10 + $0x288] ss:$16 sps:$4 sm:$0xff]  }
 0x349   :  { %v647_v35 = vadd.f32 %v630_v21, %v578_v27  ;;  %v5801_v36 = vadd.f32 %v638_v22, %v619_v28  ;;  %v582_v37 = vpop.f32.mrb[7].mxu1  ;;  %v623_v38 = vpop.f32.mrb[11].mxu0  ;;  %v4732_v21 = vld [vmem:[#allocation10 + $0x264] ss:$16 sps:$4 sm:$0xff]   ;;  %v4735_v22 = vld [vmem:[#allocation10 + $0x26c] ss:$16 sps:$4 sm:$0xff]  }
 0x34a   :  { %v648_v13 = vadd.f32 %v634_v25, %v580_v31  ;;  %v650_v39 = vadd.f32 %v642_v26, %v621_v32  ;;  %v4730_v24 = vld [vmem:[#allocation10 + $0x260] ss:$16 sps:$4 sm:$0xff]   ;;  %v4733_v25 = vld [vmem:[#allocation10 + $0x268] ss:$16 sps:$4 sm:$0xff]   ;;  %v4738_v26 = vld [vmem:[#allocation10 + $0x284] ss:$16 sps:$4 sm:$0xff]  }
 0x34b   :  { %v651_v40 = vmin.f32 %v647_v35, 20.0  ;;  %v653_v23 = vmin.f32 %v5801_v36, 20.0  ;;  %v4741_v27 = vld [vmem:[#allocation10 + $0x28c] ss:$16 sps:$4 sm:$0xff]   ;;  %v4736_v29 = vld [vmem:[#allocation10 + $0x280] ss:$16 sps:$4 sm:$0xff]  }
 0x34c   :  { %v652_v41 = vmin.f32 %v648_v13, 20.0  ;;  %v654_v42 = vmin.f32 %v650_v39, 20.0  ;;  %v4744_v31 = vld [vmem:[#allocation10 + $0x2a4] ss:$16 sps:$4 sm:$0xff]   ;;  %v4747_v32 = vld [vmem:[#allocation10 + $0x2ac] ss:$16 sps:$4 sm:$0xff]  }
 0x34d   :  { %v655_v43 = vmul.f32 1.442695, %v651_v40  ;;  %v659_v28 = vmul.f32 1.442695, %v653_v23  ;;  %v4742_v33 = vld [vmem:[#allocation10 + $0x2a0] ss:$16 sps:$4 sm:$0xff]  }
 0x34e   :  { %v657_v44 = vmul.f32 1.442695, %v652_v41  ;;  %v661_v45 = vmul.f32 1.442695, %v654_v42  ;;  %v4745_v34 = vld [vmem:[#allocation10 + $0x2a8] ss:$16 sps:$4 sm:$0xff]  }
 0x34f   :  { %5232 = vpow2.f32 %v655_v43  ;;  %v4753_v37 = vld [vmem:[#allocation10 + $0x2cc] ss:$16 sps:$4 sm:$0xff]   ;;  %v4748_v38 = vld [vmem:[#allocation10 + $0x2c0] ss:$16 sps:$4 sm:$0xff]   ;;  %v4757_v42 = vld [vmem:[#allocation10 + $0x2e8] ss:$16 sps:$4 sm:$0xff]  }
 0x350   :  { %5234 = vpow2.f32 %v657_v44  ;;  %v4759_v40 = vld [vmem:[#allocation10 + $0x2ec] ss:$16 sps:$4 sm:$0xff]   ;;  %v4754_v41 = vld [vmem:[#allocation10 + $0x2e0] ss:$16 sps:$4 sm:$0xff]   ;;  %v4762_v44 = vld [vmem:[#allocation10 + $0x304] ss:$16 sps:$4 sm:$0xff]  }
 0x351   :  { %5236 = vpow2.f32 %v661_v45  ;;  %v4765_v45 = vld [vmem:[#allocation10 + $0x30c] ss:$16 sps:$4 sm:$0xff]   ;;  %v4810_v23 = vld [vmem:[#allocation11 + $0x4] ss:$16 sps:$4 sm:$0xff]  }
 0x359   :  { %v5233_v46 = vpop.eup %5232 }
 0x35a   :  { %v663_v47 = vadd.f32 2.0, %v5233_v46  ;;  %v5235_v11 = vpop.eup %5234 }
 0x35b   :  { %v5237_v48 = vpop.eup %5236  ;;  %v664_v50 = vadd.f32 2.0, %v5235_v11 }
 0x35c   :  { %v667_v49 = vmul.f32 %v5233_v46, %v663_v47  ;;  %v666_v51 = vadd.f32 2.0, %v5237_v48  ;;  %v4760_v47 = vld [vmem:[#allocation10 + $0x300] ss:$16 sps:$4 sm:$0xff]  }
 0x35d   :  { %v668_v53 = vmul.f32 %v5235_v11, %v664_v50  ;;  %v4763_v11 = vld [vmem:[#allocation10 + $0x308] ss:$16 sps:$4 sm:$0xff]  }
 0x35e   :  { %v671_v52 = vadd.f32 2.0, %v667_v49  ;;  %v670_v54 = vmul.f32 %v5237_v48, %v666_v51  ;;  %v4768_v48 = vld [vmem:[#allocation10 + $0x324] ss:$16 sps:$4 sm:$0xff]   ;;  %v4766_v51 = vld [vmem:[#allocation10 + $0x320] ss:$16 sps:$4 sm:$0xff]  }
 0x35f   :  { %v672_v55 = vadd.f32 2.0, %v668_v53 }
 0x360   :  { %5238 = vrcp.f32 %v671_v52  ;;  %v674_v56 = vadd.f32 2.0, %v670_v54  ;;  %v4769_v52 = vld [vmem:[#allocation10 + $0x328] ss:$16 sps:$4 sm:$0xff]  }
 0x361   :  { %5240 = vrcp.f32 %v672_v55 }
 0x362   :  { %5242 = vrcp.f32 %v674_v56  ;;  %v4772_v56 = vld [vmem:[#allocation10 + $0x340] ss:$16 sps:$4 sm:$0xff]  }
 0x363   :  { %5244 = vpow2.f32 %v659_v28  ;;  %v4816_v28 = vld [vmem:[#allocation11 + $0x24] ss:$16 sps:$4 sm:$0xff]  }
 0x36a   :  { %v5239_v57 = vpop.eup %5238 }
 0x36b   :  { %v679_v58 = vmul.f32 %v5239_v57, %v667_v49  ;;  %v5241_v59 = vpop.eup %5240  ;;  %v4771_v49 = vld [vmem:[#allocation10 + $0x32c] ss:$16 sps:$4 sm:$0xff]   ;;  %v4775_v57 = vld [vmem:[#allocation10 + $0x348] ss:$16 sps:$4 sm:$0xff]  }
 0x36c   :  { %v5243_v60 = vpop.eup %5242  ;;  %v680_v61 = vmul.f32 %v5241_v59, %v668_v53  ;;  %v4774_v53 = vld [vmem:[#allocation10 + $0x344] ss:$16 sps:$4 sm:$0xff]   ;;  %v4783_v59 = vld [vmem:[#allocation10 + $0x36c] ss:$16 sps:$4 sm:$0xff]  }
 0x36d   :  { %v683_v62 = vmul.f32 %v679_v58, %v647_v35  ;;  %v682_v63 = vmul.f32 %v5243_v60, %v670_v54  ;;  %v4750_v35 = vld [vmem:[#allocation10 + $0x2c4] ss:$16 sps:$4 sm:$0xff]   ;;  %v5245_v43 = vpop.eup %5244  ;;  %v4777_v54 = vld [vmem:[#allocation10 + $0x34c] ss:$16 sps:$4 sm:$0xff]   ;;  %v4778_v60 = vld [vmem:[#allocation10 + $0x360] ss:$16 sps:$4 sm:$0xff]  }
 0x36e   :  { %v684_v1 = vmul.f32 %v680_v61, %v648_v13  ;;  %v4751_v13 = vld [vmem:[#allocation10 + $0x2c8] ss:$16 sps:$4 sm:$0xff]   ;;  %v665_v46 = vadd.f32 2.0, %v5245_v43  ;;  %v4780_v58 = vld [vmem:[#allocation10 + $0x364] ss:$16 sps:$4 sm:$0xff]  }
 0x36f   :  { %v686_v2 = vmul.f32 %v682_v63, %v650_v39  ;;  %v687_v6 = vpack.c.bf16 %v683_v62, %v683_v62  ;;  %v4756_v39 = vld [vmem:[#allocation10 + $0x2e4] ss:$16 sps:$4 sm:$0xff]   ;;  %v4781_v61 = vld [vmem:[#allocation10 + $0x368] ss:$16 sps:$4 sm:$0xff]   ;;  %v4789_v63 = vld [vmem:[#allocation10 + $0x38c] ss:$16 sps:$4 sm:$0xff]  }
 0x370   :  { %v688_v3 = vpack.c.bf16 %v684_v1, %v684_v1  ;;  %v669_v50 = vmul.f32 %v5245_v43, %v665_v46  ;;  %v4786_v62 = vld [vmem:[#allocation10 + $0x384] ss:$16 sps:$4 sm:$0xff]   ;;  %v4784_v1 = vld [vmem:[#allocation10 + $0x380] ss:$16 sps:$4 sm:$0xff]   ;;  %v4841_v46 = vld [vmem:[#allocation11 + $0xa8] ss:$16 sps:$4 sm:$0xff]  }
 0x371   :  { %v690_v9 = vpack.c.bf16 %v686_v2, %v686_v2  ;;  %v4787_v2 = vld [vmem:[#allocation10 + $0x388] ss:$16 sps:$4 sm:$0xff]   ;;  %v4840_v43 = vld [vmem:[#allocation11 + $0xa4] ss:$16 sps:$4 sm:$0xff]  }
 0x372   :  { %1513 = vmatprep.mubr.bf16.mxu1 %v688_v3  ;;  %1595 = vmatprep.mubr.bf16.mxu0 %v688_v3  ;;  %v673_v55 = vadd.f32 2.0, %v669_v50  ;;  %v4792_v3 = vld [vmem:[#allocation10 + $0x3a4] ss:$16 sps:$4 sm:$0xff]  }
 0x373   :  { %1514 = vmatmul.mubr.bf16.vlgmr.msra.gmra.mrb[8].mxu1 %v687_v6  ;;  %1596 = vmatmul.mubr.bf16.vlgmr.msra.gmra.mrb[12].mxu0 %v687_v6  ;;  %v4793_v6 = vld [vmem:[#allocation10 + $0x3a8] ss:$16 sps:$4 sm:$0xff]  }
 0x374   :  { %1523 = vmatpush1.bf16.msra.mxu1 %v4712_v4  ;;  %1605 = vmatpush1.bf16.msra.mxu0 %v4715_v5  ;;  %5246 = vrcp.f32 %v673_v55  ;;  %v4795_v4 = vld [vmem:[#allocation10 + $0x3ac] ss:$16 sps:$4 sm:$0xff]   ;;  %v4790_v5 = vld [vmem:[#allocation10 + $0x3a0] ss:$16 sps:$4 sm:$0xff]  }
 0x375   :  { %1554 = vmatprep.mubr.bf16.mxu1 %v690_v9  ;;  %1636 = vmatprep.mubr.bf16.mxu0 %v690_v9  ;;  %v4861_v55 = vld [vmem:[#allocation11 + $0x10c] ss:$16 sps:$4 sm:$0xff]  }
 0x376   :  { %1524 = vmatprep.subr.bf16.mxu1 %v4720_v7  ;;  %1606 = vmatprep.subr.bf16.mxu0 %v4723_v8  ;;  %v4798_v7 = vld [vmem:[#allocation10 + $0x3c4] ss:$16 sps:$4 sm:$0xff]   ;;  %v4801_v8 = vld [vmem:[#allocation10 + $0x3cc] ss:$16 sps:$4 sm:$0xff]  }
 0x378   :  { %1525 = vmatpush1.bf16.msra.mxu1 %v4718_v10  ;;  %1607 = vmatpush1.bf16.msra.mxu0 %v4721_v0  ;;  %v4796_v10 = vld [vmem:[#allocation10 + $0x3c0] ss:$16 sps:$4 sm:$0xff]   ;;  %v4799_v0 = vld [vmem:[#allocation10 + $0x3c8] ss:$16 sps:$4 sm:$0xff]  }
 0x379   :  { %1526 = vmatprep.subr.bf16.mxu1 %v4726_v12  ;;  %1608 = vmatprep.subr.bf16.mxu0 %v4729_v14  ;;  %v4804_v14 = vld [vmem:[#allocation10 + $0x3e4] ss:$16 sps:$4 sm:$0xff]  }
 0x37c   :  { %1527 = vmatpush1.bf16.msra.mxu1 %v4724_v15  ;;  %1609 = vmatpush1.bf16.msra.mxu0 %v4727_v18  ;;  %v4807_v15 = vld [vmem:[#allocation10 + $0x3ec] ss:$16 sps:$4 sm:$0xff]   ;;  %v4802_v18 = vld [vmem:[#allocation10 + $0x3e0] ss:$16 sps:$4 sm:$0xff]  }
 0x37d   :  { %1528 = vmatprep.subr.bf16.mxu1 %v4732_v21  ;;  %1610 = vmatprep.subr.bf16.mxu0 %v4735_v22  ;;  %v4805_v21 = vld [vmem:[#allocation10 + $0x3e8] ss:$16 sps:$4 sm:$0xff]  }
 0x37e   :  { %v5247_v9 = vpop.eup %5246 }
 0x37f   :  { %v681_v12 = vmul.f32 %v5247_v9, %v669_v50  ;;  %v4852_v50 = vld [vmem:[#allocation11 + $0xe4] ss:$16 sps:$4 sm:$0xff]   ;;  %v4880_v9 = vld [vmem:[#allocation11 + $0x180] ss:$16 sps:$4 sm:$0xff]  }
 0x380   :  { %1529 = vmatpush1.bf16.msra.mxu1 %v4730_v24  ;;  %1611 = vmatpush1.bf16.msra.mxu0 %v4733_v25  ;;  %v4813_v24 = vld [vmem:[#allocation11 + $0xc] ss:$16 sps:$4 sm:$0xff]   ;;  %v4808_v25 = vld [vmem:[#allocation11] ss:$16 sps:$4 sm:$0xff]  }
 0x381   :  { %1530 = vmatprep.subr.bf16.mxu1 %v4738_v26  ;;  %1612 = vmatprep.subr.bf16.mxu0 %v4741_v27  ;;  %v685_v22 = vmul.f32 %v681_v12, %v5801_v36  ;;  %v4811_v26 = vld [vmem:[#allocation11 + $0x8] ss:$16 sps:$4 sm:$0xff]   ;;  %v4822_v36 = vld [vmem:[#allocation11 + $0x44] ss:$16 sps:$4 sm:$0xff]   ;;  %v4891_v12 = vld [vmem:[#allocation11 + $0x1ac] ss:$16 sps:$4 sm:$0xff]  }
 0x383   :  { %v689_v27 = vpack.c.bf16 %v685_v22, %v685_v22  ;;  %v4892_v22 = vld [vmem:[#allocation11 + $0x1c0] ss:$16 sps:$4 sm:$0xff]  }
 0x384   :  { %1531 = vmatpush1.bf16.msra.mxu1 %v4736_v29  ;;  %1613 = vmatpush1.bf16.msra.mxu0 %v4739_v30  ;;  %v4819_v29 = vld [vmem:[#allocation11 + $0x2c] ss:$16 sps:$4 sm:$0xff]   ;;  %v4814_v30 = vld [vmem:[#allocation11 + $0x20] ss:$16 sps:$4 sm:$0xff]  }
 0x385   :  { %1532 = vmatprep.subr.bf16.mxu1 %v4744_v31  ;;  %1614 = vmatprep.subr.bf16.mxu0 %v4747_v32  ;;  %v4817_v31 = vld [vmem:[#allocation11 + $0x28] ss:$16 sps:$4 sm:$0xff]   ;;  %v4825_v32 = vld [vmem:[#allocation11 + $0x4c] ss:$16 sps:$4 sm:$0xff]  }
 0x388   :  { %1533 = vmatpush1.bf16.msra.mxu1 %v4742_v33  ;;  %1615 = vmatpush1.bf16.msra.mxu0 %v4745_v34  ;;  %v4820_v33 = vld [vmem:[#allocation11 + $0x40] ss:$16 sps:$4 sm:$0xff]   ;;  %v4823_v34 = vld [vmem:[#allocation11 + $0x48] ss:$16 sps:$4 sm:$0xff]  }
 0x389   :  { %1534 = vmatprep.subr.bf16.mxu1 %v4750_v35  ;;  %1616 = vmatprep.subr.bf16.mxu0 %v4753_v37  ;;  %v4828_v35 = vld [vmem:[#allocation11 + $0x64] ss:$16 sps:$4 sm:$0xff]   ;;  %v4831_v37 = vld [vmem:[#allocation11 + $0x6c] ss:$16 sps:$4 sm:$0xff]  }
 0x38c   :  { %1535 = vmatpush1.bf16.msra.mxu1 %v4748_v38  ;;  %1617 = vmatpush1.bf16.msra.mxu0 %v4751_v13  ;;  %v4826_v38 = vld [vmem:[#allocation11 + $0x60] ss:$16 sps:$4 sm:$0xff]   ;;  %v4829_v13 = vld [vmem:[#allocation11 + $0x68] ss:$16 sps:$4 sm:$0xff]  }
 0x38d   :  { %1536 = vmatprep.subr.bf16.mxu1 %v4756_v39  ;;  %1618 = vmatprep.subr.bf16.mxu0 %v4759_v40  ;;  %v4834_v39 = vld [vmem:[#allocation11 + $0x84] ss:$16 sps:$4 sm:$0xff]   ;;  %v4837_v40 = vld [vmem:[#allocation11 + $0x8c] ss:$16 sps:$4 sm:$0xff]  }
 0x390   :  { %1537 = vmatpush1.bf16.msra.mxu1 %v4754_v41  ;;  %1619 = vmatpush1.bf16.msra.mxu0 %v4757_v42  ;;  %v4832_v41 = vld [vmem:[#allocation11 + $0x80] ss:$16 sps:$4 sm:$0xff]   ;;  %v4835_v42 = vld [vmem:[#allocation11 + $0x88] ss:$16 sps:$4 sm:$0xff]  }
 0x391   :  { %1538 = vmatprep.subr.bf16.mxu1 %v4762_v44  ;;  %1620 = vmatprep.subr.bf16.mxu0 %v4765_v45  ;;  %v4843_v44 = vld [vmem:[#allocation11 + $0xac] ss:$16 sps:$4 sm:$0xff]   ;;  %v4838_v45 = vld [vmem:[#allocation11 + $0xa0] ss:$16 sps:$4 sm:$0xff]  }
 0x394   :  { %1539 = vmatpush1.bf16.msra.mxu1 %v4760_v47  ;;  %1621 = vmatpush1.bf16.msra.mxu0 %v4763_v11  ;;  %v4846_v47 = vld [vmem:[#allocation11 + $0xc4] ss:$16 sps:$4 sm:$0xff]   ;;  %v4849_v11 = vld [vmem:[#allocation11 + $0xcc] ss:$16 sps:$4 sm:$0xff]  }
 0x395   :  { %1540 = vmatprep.subr.bf16.mxu1 %v4768_v48  ;;  %1622 = vmatprep.subr.bf16.mxu0 %v4771_v49  ;;  %v4844_v48 = vld [vmem:[#allocation11 + $0xc0] ss:$16 sps:$4 sm:$0xff]   ;;  %v4847_v49 = vld [vmem:[#allocation11 + $0xc8] ss:$16 sps:$4 sm:$0xff]  }
 0x398   :  { %1541 = vmatpush1.bf16.msra.mxu1 %v4766_v51  ;;  %1623 = vmatpush1.bf16.msra.mxu0 %v4769_v52  ;;  %v4855_v51 = vld [vmem:[#allocation11 + $0xec] ss:$16 sps:$4 sm:$0xff]   ;;  %v4850_v52 = vld [vmem:[#allocation11 + $0xe0] ss:$16 sps:$4 sm:$0xff]  }
 0x399   :  { %1542 = vmatprep.subr.bf16.mxu1 %v4774_v53  ;;  %1624 = vmatprep.subr.bf16.mxu0 %v4777_v54  ;;  %v4853_v53 = vld [vmem:[#allocation11 + $0xe8] ss:$16 sps:$4 sm:$0xff]   ;;  %v4858_v54 = vld [vmem:[#allocation11 + $0x104] ss:$16 sps:$4 sm:$0xff]  }
 0x39c   :  { %1543 = vmatpush1.bf16.msra.mxu1 %v4772_v56  ;;  %1625 = vmatpush1.bf16.msra.mxu0 %v4775_v57  ;;  %v4856_v56 = vld [vmem:[#allocation11 + $0x100] ss:$16 sps:$4 sm:$0xff]   ;;  %v4859_v57 = vld [vmem:[#allocation11 + $0x108] ss:$16 sps:$4 sm:$0xff]  }
 0x39d   :  { %1544 = vmatprep.subr.bf16.mxu1 %v4780_v58  ;;  %1626 = vmatprep.subr.bf16.mxu0 %v4783_v59  ;;  %v4864_v58 = vld [vmem:[#allocation11 + $0x124] ss:$16 sps:$4 sm:$0xff]   ;;  %v4867_v59 = vld [vmem:[#allocation11 + $0x12c] ss:$16 sps:$4 sm:$0xff]  }
 0x3a0   :  { %1545 = vmatpush1.bf16.msra.mxu1 %v4778_v60  ;;  %1627 = vmatpush1.bf16.msra.mxu0 %v4781_v61  ;;  %v4862_v60 = vld [vmem:[#allocation11 + $0x120] ss:$16 sps:$4 sm:$0xff]   ;;  %v4865_v61 = vld [vmem:[#allocation11 + $0x128] ss:$16 sps:$4 sm:$0xff]  }
 0x3a1   :  { %1546 = vmatprep.subr.bf16.mxu1 %v4786_v62  ;;  %1628 = vmatprep.subr.bf16.mxu0 %v4789_v63  ;;  %v4870_v62 = vld [vmem:[#allocation11 + $0x144] ss:$16 sps:$4 sm:$0xff]   ;;  %v4873_v63 = vld [vmem:[#allocation11 + $0x14c] ss:$16 sps:$4 sm:$0xff]  }
 0x3a4   :  { %1547 = vmatpush1.bf16.msra.mxu1 %v4784_v1  ;;  %1629 = vmatpush1.bf16.msra.mxu0 %v4787_v2  ;;  %v4868_v1 = vld [vmem:[#allocation11 + $0x140] ss:$16 sps:$4 sm:$0xff]   ;;  %v4871_v2 = vld [vmem:[#allocation11 + $0x148] ss:$16 sps:$4 sm:$0xff]  }
 0x3a5   :  { %1548 = vmatprep.subr.bf16.mxu1 %v4792_v3  ;;  %1630 = vmatprep.subr.bf16.mxu0 %v4795_v4  ;;  %v4876_v3 = vld [vmem:[#allocation11 + $0x164] ss:$16 sps:$4 sm:$0xff]   ;;  %v4879_v4 = vld [vmem:[#allocation11 + $0x16c] ss:$16 sps:$4 sm:$0xff]  }
 0x3a8   :  { %1549 = vmatpush1.bf16.msra.mxu1 %v4790_v5  ;;  %1631 = vmatpush1.bf16.msra.mxu0 %v4793_v6  ;;  %v4874_v5 = vld [vmem:[#allocation11 + $0x160] ss:$16 sps:$4 sm:$0xff]   ;;  %v4877_v6 = vld [vmem:[#allocation11 + $0x168] ss:$16 sps:$4 sm:$0xff]  }
 0x3a9   :  { %1550 = vmatprep.subr.bf16.mxu1 %v4798_v7  ;;  %1632 = vmatprep.subr.bf16.mxu0 %v4801_v8  ;;  %v4882_v7 = vld [vmem:[#allocation11 + $0x184] ss:$16 sps:$4 sm:$0xff]   ;;  %v4885_v8 = vld [vmem:[#allocation11 + $0x18c] ss:$16 sps:$4 sm:$0xff]  }
 0x3ac   :  { %1551 = vmatpush1.bf16.msra.mxu1 %v4796_v10  ;;  %1633 = vmatpush1.bf16.msra.mxu0 %v4799_v0  ;;  %v4883_v10 = vld [vmem:[#allocation11 + $0x188] ss:$16 sps:$4 sm:$0xff]   ;;  %v4888_v0 = vld [vmem:[#allocation11 + $0x1a4] ss:$16 sps:$4 sm:$0xff]  }
 0x3ad   :  { %1552 = vmatprep.subr.bf16.mxu1 %v4804_v14  ;;  %1634 = vmatprep.subr.bf16.mxu0 %v4807_v15  ;;  %v4886_v14 = vld [vmem:[#allocation11 + $0x1a0] ss:$16 sps:$4 sm:$0xff]   ;;  %v4889_v15 = vld [vmem:[#allocation11 + $0x1a8] ss:$16 sps:$4 sm:$0xff]  }
 0x3b0   :  { %1553 = vmatpush1.bf16.msra.mxu1 %v4802_v18  ;;  %1635 = vmatpush1.bf16.msra.mxu0 %v4805_v21  ;;  %v4894_v18 = vld [vmem:[#allocation11 + $0x1c4] ss:$16 sps:$4 sm:$0xff]   ;;  %v4897_v21 = vld [vmem:[#allocation11 + $0x1cc] ss:$16 sps:$4 sm:$0xff]  }
 0x3b1   :  { %2475 = vmatprep.subr.bf16.mxu1 %v4810_v23  ;;  %2557 = vmatprep.subr.bf16.mxu0 %v4813_v24  ;;  %v4895_v23 = vld [vmem:[#allocation11 + $0x1c8] ss:$16 sps:$4 sm:$0xff]   ;;  %v4900_v24 = vld [vmem:[#allocation11 + $0x1e4] ss:$16 sps:$4 sm:$0xff]  }
 0x3b3   :  { %1555 = vmatmul.mubr.bf16.vlgmr.msra.gmra.mrb[8].mxu1 %v689_v27  ;;  %1637 = vmatmul.mubr.bf16.vlgmr.msra.gmra.mrb[12].mxu0 %v689_v27  ;;  %v4901_v27 = vld [vmem:[#allocation11 + $0x1e8] ss:$16 sps:$4 sm:$0xff]  }
 0x3b4   :  { %2476 = vmatpush1.bf16.msra.mxu1 %v4808_v25  ;;  %2558 = vmatpush1.bf16.msra.mxu0 %v4811_v26  ;;  %v4903_v25 = vld [vmem:[#allocation11 + $0x1ec] ss:$16 sps:$4 sm:$0xff]   ;;  %v4898_v26 = vld [vmem:[#allocation11 + $0x1e0] ss:$16 sps:$4 sm:$0xff]  }
 0x3b5   :  { %2477 = vmatprep.subr.bf16.mxu1 %v4816_v28  ;;  %2559 = vmatprep.subr.bf16.mxu0 %v4819_v29  ;;  %v4906_v28 = vld [vmem:[#allocation11 + $0x204] ss:$16 sps:$4 sm:$0xff]   ;;  %v4909_v29 = vld [vmem:[#allocation11 + $0x20c] ss:$16 sps:$4 sm:$0xff]  }
 0x3b8   :  { %2478 = vmatpush1.bf16.msra.mxu1 %v4814_v30  ;;  %2560 = vmatpush1.bf16.msra.mxu0 %v4817_v31  ;;  %v5808_v30 = vld [vmem:[%s5877_s10] sm:$0xf] }
 0x3b9   :  { %2479 = vmatprep.subr.bf16.mxu1 %v4822_v36  ;;  %2561 = vmatprep.subr.bf16.mxu0 %v4825_v32  ;;  %v824_v31 = vrot.slane %v5808_v30, %v5786_v16  ;;  %v828_v36 = vrot.slane %v5808_v30, %v5793_v19  ;;  %v836_v32 = vrot.slane %v5808_v30, %v5795_v20 }
 0x3bc   :  { %2480 = vmatpush1.bf16.msra.mxu1 %v4820_v33  ;;  %2562 = vmatpush1.bf16.msra.mxu0 %v4823_v34 }
 0x3bd   :  { %2481 = vmatprep.subr.bf16.mxu1 %v4828_v35  ;;  %2563 = vmatprep.subr.bf16.mxu0 %v4831_v37 }
 0x3c0   :  { %2482 = vmatpush1.bf16.msra.mxu1 %v4826_v38  ;;  %2564 = vmatpush1.bf16.msra.mxu0 %v4829_v13 }
 0x3c1   :  { %2483 = vmatprep.subr.bf16.mxu1 %v4834_v39  ;;  %2565 = vmatprep.subr.bf16.mxu0 %v4837_v40 }
 0x3c4   :  { %2484 = vmatpush1.bf16.msra.mxu1 %v4832_v41  ;;  %2566 = vmatpush1.bf16.msra.mxu0 %v4835_v42 }
 0x3c5   :  { %2485 = vmatprep.subr.bf16.mxu1 %v4840_v43  ;;  %2567 = vmatprep.subr.bf16.mxu0 %v4843_v44 }
 0x3c8   :  { %2486 = vmatpush1.bf16.msra.mxu1 %v4838_v45  ;;  %2568 = vmatpush1.bf16.msra.mxu0 %v4841_v46 }
 0x3c9   :  { %2487 = vmatprep.subr.bf16.mxu1 %v4846_v47  ;;  %2569 = vmatprep.subr.bf16.mxu0 %v4849_v11 }
 0x3cc   :  { %2488 = vmatpush1.bf16.msra.mxu1 %v4844_v48  ;;  %2570 = vmatpush1.bf16.msra.mxu0 %v4847_v49 }
 0x3cd   :  { %2489 = vmatprep.subr.bf16.mxu1 %v4852_v50  ;;  %2571 = vmatprep.subr.bf16.mxu0 %v4855_v51 }
 0x3d0   :  { %2490 = vmatpush1.bf16.msra.mxu1 %v4850_v52  ;;  %2572 = vmatpush1.bf16.msra.mxu0 %v4853_v53 }
 0x3d1   :  { %2491 = vmatprep.subr.bf16.mxu1 %v4858_v54  ;;  %2573 = vmatprep.subr.bf16.mxu0 %v4861_v55 }
 0x3d4   :  { %2492 = vmatpush1.bf16.msra.mxu1 %v4856_v56  ;;  %2574 = vmatpush1.bf16.msra.mxu0 %v4859_v57 }
 0x3d5   :  { %2493 = vmatprep.subr.bf16.mxu1 %v4864_v58  ;;  %2575 = vmatprep.subr.bf16.mxu0 %v4867_v59 }
 0x3d8   :  { %2494 = vmatpush1.bf16.msra.mxu1 %v4862_v60  ;;  %2576 = vmatpush1.bf16.msra.mxu0 %v4865_v61 }
 0x3d9   :  { %2495 = vmatprep.subr.bf16.mxu1 %v4870_v62  ;;  %2577 = vmatprep.subr.bf16.mxu0 %v4873_v63 }
 0x3dc   :  { %2496 = vmatpush1.bf16.msra.mxu1 %v4868_v1  ;;  %2578 = vmatpush1.bf16.msra.mxu0 %v4871_v2 }
 0x3dd   :  { %2497 = vmatprep.subr.bf16.mxu1 %v4876_v3  ;;  %2579 = vmatprep.subr.bf16.mxu0 %v4879_v4 }
 0x3e0   :  { %2498 = vmatpush1.bf16.msra.mxu1 %v4874_v5  ;;  %2580 = vmatpush1.bf16.msra.mxu0 %v4877_v6 }
 0x3e1   :  { %2499 = vmatprep.subr.bf16.mxu1 %v4882_v7  ;;  %2581 = vmatprep.subr.bf16.mxu0 %v4885_v8  ;;  %v4904_v8 = vld [vmem:[#allocation11 + $0x200] ss:$16 sps:$4 sm:$0xff]  }
 0x3e4   :  { %2500 = vmatpush1.bf16.msra.mxu1 %v4880_v9  ;;  %2582 = vmatpush1.bf16.msra.mxu0 %v4883_v10  ;;  %v4907_v9 = vld [vmem:[#allocation11 + $0x208] ss:$16 sps:$4 sm:$0xff]  }
 0x3e5   :  { %2501 = vmatprep.subr.bf16.mxu1 %v4888_v0  ;;  %2583 = vmatprep.subr.bf16.mxu0 %v4891_v12  ;;  %v4912_v0 = vld [vmem:[#allocation11 + $0x224] ss:$16 sps:$4 sm:$0xff]   ;;  %v4915_v12 = vld [vmem:[#allocation11 + $0x22c] ss:$16 sps:$4 sm:$0xff]  }
 0x3e8   :  { %2502 = vmatpush1.bf16.msra.mxu1 %v4886_v14  ;;  %2584 = vmatpush1.bf16.msra.mxu0 %v4889_v15  ;;  %v832_v14 = vrot.slane %v5808_v30, %v5788_v17  ;;  %v4922_v30 = vld [vmem:[#allocation11 + $0x260] ss:$16 sps:$4 sm:$0xff]  }
 0x3e9   :  { %2503 = vmatprep.subr.bf16.mxu1 %v4894_v18  ;;  %2585 = vmatprep.subr.bf16.mxu0 %v4897_v21  ;;  %v4910_v18 = vld [vmem:[#allocation11 + $0x220] ss:$16 sps:$4 sm:$0xff]   ;;  %v4913_v21 = vld [vmem:[#allocation11 + $0x228] ss:$16 sps:$4 sm:$0xff]  }
 0x3ec   :  { %2504 = vmatpush1.bf16.msra.mxu1 %v4892_v22  ;;  %2586 = vmatpush1.bf16.msra.mxu0 %v4895_v23  ;;  %v4918_v22 = vld [vmem:[#allocation11 + $0x244] ss:$16 sps:$4 sm:$0xff]   ;;  %v4921_v23 = vld [vmem:[#allocation11 + $0x24c] ss:$16 sps:$4 sm:$0xff]  }
 0x3ed   :  { %2505 = vmatprep.subr.bf16.mxu1 %v4900_v24  ;;  %2587 = vmatprep.subr.bf16.mxu0 %v4903_v25  ;;  %v4916_v25 = vld [vmem:[#allocation11 + $0x240] ss:$16 sps:$4 sm:$0xff]  }
 0x3f0   :  { %2506 = vmatpush1.bf16.msra.mxu1 %v4898_v26  ;;  %2588 = vmatpush1.bf16.msra.mxu0 %v4901_v27  ;;  %v4919_v26 = vld [vmem:[#allocation11 + $0x248] ss:$16 sps:$4 sm:$0xff]   ;;  %v4924_v27 = vld [vmem:[#allocation11 + $0x264] ss:$16 sps:$4 sm:$0xff]  }
 0x3f1   :  { %2516 = vmatprep.subr.bf16.mxu1 %v4906_v28  ;;  %2598 = vmatprep.subr.bf16.mxu0 %v4909_v29  ;;  %v4927_v28 = vld [vmem:[#allocation11 + $0x26c] ss:$16 sps:$4 sm:$0xff]  }
 0x486   :  { %v1556_v33 = vpop.f32.mrb[8].mxu1  ;;  %v5816_v34 = vpop.f32.mrb[12].mxu0 }
 0x487   :  { %v4534_v35 = vadd.f32 %v1556_v33, %v824_v31  ;;  %v1558_v37 = vpop.f32.mrb[9].mxu1  ;;  %v1640_v38 = vpop.f32.mrb[13].mxu0  ;;  %v5821_v24 = vadd.f32 %v5816_v34, %v832_v14  ;;  %v4925_v31 = vld [vmem:[#allocation11 + $0x268] ss:$16 sps:$4 sm:$0xff]   ;;  %v4928_v34 = vld [vmem:[#allocation11 + $0x280] ss:$16 sps:$4 sm:$0xff]  }
 0x488   :  { %v4535_v13 = vadd.f32 %v1558_v37, %v828_v36  ;;  %v4537_v39 = vadd.f32 %v1640_v38, %v836_v32  ;;  %v1560_v40 = vpop.f32.mrb[10].mxu1  ;;  %v1642_v41 = vpop.f32.mrb[14].mxu0  ;;  %v4930_v36 = vld [vmem:[#allocation11 + $0x284] ss:$16 sps:$4 sm:$0xff]   ;;  %v4933_v32 = vld [vmem:[#allocation11 + $0x28c] ss:$16 sps:$4 sm:$0xff]  }
 0x489   :  { %v1645_v42 = vmin.f32 %v4534_v35, 20.0  ;;  %v1561_v43 = vpop.f32.mrb[11].mxu1  ;;  %v1643_v44 = vpop.f32.mrb[15].mxu0  ;;  %v1647_v29 = vmin.f32 %v5821_v24, 20.0  ;;  %v4936_v37 = vld [vmem:[#allocation11 + $0x2a4] ss:$16 sps:$4 sm:$0xff]  }
 0x48a   :  { %v1646_v45 = vmin.f32 %v4535_v13, 20.0  ;;  %v1648_v46 = vmin.f32 %v4537_v39, 20.0  ;;  %v4939_v38 = vld [vmem:[#allocation11 + $0x2ac] ss:$16 sps:$4 sm:$0xff]   ;;  %v4942_v40 = vld [vmem:[#allocation11 + $0x2c4] ss:$16 sps:$4 sm:$0xff]  }
 0x48b   :  { %v1649_v47 = vmul.f32 1.442695, %v1645_v42  ;;  %v1653_v33 = vmul.f32 1.442695, %v1647_v29  ;;  %v4945_v41 = vld [vmem:[#allocation11 + $0x2cc] ss:$16 sps:$4 sm:$0xff]  }
 0x48c   :  { %v1651_v11 = vmul.f32 1.442695, %v1646_v45  ;;  %v1655_v48 = vmul.f32 1.442695, %v1648_v46  ;;  %v4940_v42 = vld [vmem:[#allocation11 + $0x2c0] ss:$16 sps:$4 sm:$0xff]  }
 0x48d   :  { %5248 = vpow2.f32 %v1649_v47  ;;  %v4943_v43 = vld [vmem:[#allocation11 + $0x2c8] ss:$16 sps:$4 sm:$0xff]   ;;  %v4948_v44 = vld [vmem:[#allocation11 + $0x2e4] ss:$16 sps:$4 sm:$0xff]   ;;  %v4951_v45 = vld [vmem:[#allocation11 + $0x2ec] ss:$16 sps:$4 sm:$0xff]  }
 0x48e   :  { %5250 = vpow2.f32 %v1651_v11  ;;  %v4946_v46 = vld [vmem:[#allocation11 + $0x2e0] ss:$16 sps:$4 sm:$0xff]   ;;  %v4949_v47 = vld [vmem:[#allocation11 + $0x2e8] ss:$16 sps:$4 sm:$0xff]   ;;  %v4993_v14 = vld [vmem:[#allocation11 + $0x3cc] ss:$16 sps:$4 sm:$0xff]  }
 0x48f   :  { %5252 = vpow2.f32 %v1655_v48  ;;  %v4954_v48 = vld [vmem:[#allocation11 + $0x304] ss:$16 sps:$4 sm:$0xff]  }
 0x490   :  { %v5002_v29 = vld [vmem:[#allocation13 + $0x4] ss:$16 sps:$4 sm:$0xff]  }
 0x497   :  { %v5249_v49 = vpop.eup %5248 }
 0x498   :  { %v1657_v50 = vadd.f32 2.0, %v5249_v49  ;;  %v5251_v51 = vpop.eup %5250 }
 0x499   :  { %v5253_v52 = vpop.eup %5252  ;;  %v1658_v54 = vadd.f32 2.0, %v5251_v51 }
 0x49a   :  { %v1661_v53 = vmul.f32 %v5249_v49, %v1657_v50  ;;  %v1660_v55 = vadd.f32 2.0, %v5253_v52  ;;  %v4957_v49 = vld [vmem:[#allocation11 + $0x30c] ss:$16 sps:$4 sm:$0xff]  }
 0x49b   :  { %v1662_v57 = vmul.f32 %v5251_v51, %v1658_v54  ;;  %v4952_v51 = vld [vmem:[#allocation11 + $0x300] ss:$16 sps:$4 sm:$0xff]   ;;  %v4963_v54 = vld [vmem:[#allocation11 + $0x32c] ss:$16 sps:$4 sm:$0xff]  }
 0x49c   :  { %v1665_v56 = vadd.f32 2.0, %v1661_v53  ;;  %v1664_v58 = vmul.f32 %v5253_v52, %v1660_v55  ;;  %v4955_v52 = vld [vmem:[#allocation11 + $0x308] ss:$16 sps:$4 sm:$0xff]  }
 0x49d   :  { %v1666_v59 = vadd.f32 2.0, %v1662_v57 }
 0x49e   :  { %5254 = vrcp.f32 %v1665_v56  ;;  %v1668_v60 = vadd.f32 2.0, %v1664_v58  ;;  %v4958_v56 = vld [vmem:[#allocation11 + $0x320] ss:$16 sps:$4 sm:$0xff]  }
 0x49f   :  { %5256 = vrcp.f32 %v1666_v59  ;;  %v4969_v59 = vld [vmem:[#allocation11 + $0x34c] ss:$16 sps:$4 sm:$0xff]  }
 0x4a0   :  { %5258 = vrcp.f32 %v1668_v60 }
 0x4a1   :  { %5260 = vpow2.f32 %v1653_v33  ;;  %v5008_v33 = vld [vmem:[#allocation13 + $0x24] ss:$16 sps:$4 sm:$0xff]  }
 0x4a8   :  { %v5255_v61 = vpop.eup %5254 }
 0x4a9   :  { %v1673_v62 = vmul.f32 %v5255_v61, %v1661_v53  ;;  %v5257_v63 = vpop.eup %5256  ;;  %v4960_v53 = vld [vmem:[#allocation11 + $0x324] ss:$16 sps:$4 sm:$0xff]   ;;  %v4964_v61 = vld [vmem:[#allocation11 + $0x340] ss:$16 sps:$4 sm:$0xff]  }
 0x4aa   :  { %v5259_v1 = vpop.eup %5258  ;;  %v1674_v2 = vmul.f32 %v5257_v63, %v1662_v57  ;;  %v4961_v57 = vld [vmem:[#allocation11 + $0x328] ss:$16 sps:$4 sm:$0xff]   ;;  %v4972_v63 = vld [vmem:[#allocation11 + $0x364] ss:$16 sps:$4 sm:$0xff]  }
 0x4ab   :  { %v1677_v3 = vmul.f32 %v4534_v35, %v1673_v62  ;;  %v1676_v4 = vmul.f32 %v5259_v1, %v1664_v58  ;;  %v4931_v35 = vld [vmem:[#allocation11 + $0x288] ss:$16 sps:$4 sm:$0xff]   ;;  %v5261_v11 = vpop.eup %5260  ;;  %v4966_v58 = vld [vmem:[#allocation11 + $0x344] ss:$16 sps:$4 sm:$0xff]   ;;  %v4975_v1 = vld [vmem:[#allocation11 + $0x36c] ss:$16 sps:$4 sm:$0xff]  }
 0x4ac   :  { %v1678_v5 = vmul.f32 %v4535_v13, %v1674_v2  ;;  %v4934_v13 = vld [vmem:[#allocation11 + $0x2a0] ss:$16 sps:$4 sm:$0xff]   ;;  %v1659_v50 = vadd.f32 2.0, %v5261_v11  ;;  %v4967_v62 = vld [vmem:[#allocation11 + $0x348] ss:$16 sps:$4 sm:$0xff]  }
 0x4ad   :  { %v1680_v6 = vmul.f32 %v4537_v39, %v1676_v4  ;;  %v1681_v10 = vpack.c.bf16 %v1677_v3, %v1677_v3  ;;  %v4937_v39 = vld [vmem:[#allocation11 + $0x2a8] ss:$16 sps:$4 sm:$0xff]   ;;  %v4970_v2 = vld [vmem:[#allocation11 + $0x360] ss:$16 sps:$4 sm:$0xff]   ;;  %v4978_v4 = vld [vmem:[#allocation11 + $0x384] ss:$16 sps:$4 sm:$0xff]  }
 0x4ae   :  { %v1682_v7 = vpack.c.bf16 %v1678_v5, %v1678_v5  ;;  %v1663_v55 = vmul.f32 %v5261_v11, %v1659_v50  ;;  %v4973_v3 = vld [vmem:[#allocation11 + $0x368] ss:$16 sps:$4 sm:$0xff]   ;;  %v4981_v5 = vld [vmem:[#allocation11 + $0x38c] ss:$16 sps:$4 sm:$0xff]   ;;  %v5032_v11 = vld [vmem:[#allocation13 + $0xa4] ss:$16 sps:$4 sm:$0xff]  }
 0x4af   :  { %v1684_v15 = vpack.c.bf16 %v1680_v6, %v1680_v6  ;;  %v4976_v6 = vld [vmem:[#allocation11 + $0x380] ss:$16 sps:$4 sm:$0xff]   ;;  %v5033_v50 = vld [vmem:[#allocation13 + $0xa8] ss:$16 sps:$4 sm:$0xff]  }
 0x4b0   :  { %2507 = vmatprep.mubr.bf16.mxu1 %v1682_v7  ;;  %2589 = vmatprep.mubr.bf16.mxu0 %v1682_v7  ;;  %v1667_v60 = vadd.f32 2.0, %v1663_v55  ;;  %v4979_v7 = vld [vmem:[#allocation11 + $0x388] ss:$16 sps:$4 sm:$0xff]  }
 0x4b1   :  { %2508 = vmatmul.mubr.bf16.vlgmr.msra.gmra.mrb[12].mxu1 %v1681_v10  ;;  %2590 = vmatmul.mubr.bf16.vlgmr.msra.gmra.mrb[16].mxu0 %v1681_v10  ;;  %v4982_v10 = vld [vmem:[#allocation11 + $0x3a0] ss:$16 sps:$4 sm:$0xff]  }
 0x4b2   :  { %2517 = vmatpush1.bf16.msra.mxu1 %v4904_v8  ;;  %2599 = vmatpush1.bf16.msra.mxu0 %v4907_v9  ;;  %5262 = vrcp.f32 %v1667_v60  ;;  %v4984_v8 = vld [vmem:[#allocation11 + $0x3a4] ss:$16 sps:$4 sm:$0xff]   ;;  %v4987_v9 = vld [vmem:[#allocation11 + $0x3ac] ss:$16 sps:$4 sm:$0xff]  }
 0x4b3   :  { %2548 = vmatprep.mubr.bf16.mxu1 %v1684_v15  ;;  %2630 = vmatprep.mubr.bf16.mxu0 %v1684_v15  ;;  %v5053_v60 = vld [vmem:[#allocation13 + $0x10c] ss:$16 sps:$4 sm:$0xff]  }
 0x4b4   :  { %2518 = vmatprep.subr.bf16.mxu1 %v4912_v0  ;;  %2600 = vmatprep.subr.bf16.mxu0 %v4915_v12  ;;  %v4985_v0 = vld [vmem:[#allocation11 + $0x3a8] ss:$16 sps:$4 sm:$0xff]   ;;  %v4990_v12 = vld [vmem:[#allocation11 + $0x3c4] ss:$16 sps:$4 sm:$0xff]  }
 0x4b6   :  { %2519 = vmatpush1.bf16.msra.mxu1 %v4910_v18  ;;  %2601 = vmatpush1.bf16.msra.mxu0 %v4913_v21  ;;  %v4988_v18 = vld [vmem:[#allocation11 + $0x3c0] ss:$16 sps:$4 sm:$0xff]   ;;  %v4991_v21 = vld [vmem:[#allocation11 + $0x3c8] ss:$16 sps:$4 sm:$0xff]  }
 0x4b7   :  { %2520 = vmatprep.subr.bf16.mxu1 %v4918_v22  ;;  %2602 = vmatprep.subr.bf16.mxu0 %v4921_v23  ;;  %v4996_v23 = vld [vmem:[#allocation11 + $0x3e4] ss:$16 sps:$4 sm:$0xff]  }
 0x4ba   :  { %2521 = vmatpush1.bf16.msra.mxu1 %v4916_v25  ;;  %2603 = vmatpush1.bf16.msra.mxu0 %v4919_v26  ;;  %v4999_v25 = vld [vmem:[#allocation11 + $0x3ec] ss:$16 sps:$4 sm:$0xff]   ;;  %v4994_v26 = vld [vmem:[#allocation11 + $0x3e0] ss:$16 sps:$4 sm:$0xff]  }
 0x4bb   :  { %2522 = vmatprep.subr.bf16.mxu1 %v4924_v27  ;;  %2604 = vmatprep.subr.bf16.mxu0 %v4927_v28  ;;  %v4997_v27 = vld [vmem:[#allocation11 + $0x3e8] ss:$16 sps:$4 sm:$0xff]  }
 0x4bc   :  { %v5263_v15 = vpop.eup %5262 }
 0x4bd   :  { %v1675_v22 = vmul.f32 %v5263_v15, %v1663_v55  ;;  %v5044_v55 = vld [vmem:[#allocation13 + $0xe4] ss:$16 sps:$4 sm:$0xff]   ;;  %v5072_v15 = vld [vmem:[#allocation13 + $0x180] ss:$16 sps:$4 sm:$0xff]  }
 0x4be   :  { %2523 = vmatpush1.bf16.msra.mxu1 %v4922_v30  ;;  %2605 = vmatpush1.bf16.msra.mxu0 %v4925_v31  ;;  %v5005_v30 = vld [vmem:[#allocation13 + $0xc] ss:$16 sps:$4 sm:$0xff]   ;;  %v5000_v31 = vld [vmem:[#allocation13] ss:$16 sps:$4 sm:$0xff]  }
 0x4bf   :  { %2524 = vmatprep.subr.bf16.mxu1 %v4930_v36  ;;  %2606 = vmatprep.subr.bf16.mxu0 %v4933_v32  ;;  %v1679_v28 = vmul.f32 %v5821_v24, %v1675_v22  ;;  %v5003_v36 = vld [vmem:[#allocation13 + $0x8] ss:$16 sps:$4 sm:$0xff]   ;;  %v5014_v24 = vld [vmem:[#allocation13 + $0x44] ss:$16 sps:$4 sm:$0xff]   ;;  %v5083_v22 = vld [vmem:[#allocation13 + $0x1ac] ss:$16 sps:$4 sm:$0xff]  }
 0x4c1   :  { %v1683_v32 = vpack.c.bf16 %v1679_v28, %v1679_v28  ;;  %v5084_v28 = vld [vmem:[#allocation13 + $0x1c0] ss:$16 sps:$4 sm:$0xff]  }
 0x4c2   :  { %2525 = vmatpush1.bf16.msra.mxu1 %v4928_v34  ;;  %2607 = vmatpush1.bf16.msra.mxu0 %v4931_v35  ;;  %v5011_v34 = vld [vmem:[#allocation13 + $0x2c] ss:$16 sps:$4 sm:$0xff]   ;;  %v5006_v35 = vld [vmem:[#allocation13 + $0x20] ss:$16 sps:$4 sm:$0xff]  }
 0x4c3   :  { %2526 = vmatprep.subr.bf16.mxu1 %v4936_v37  ;;  %2608 = vmatprep.subr.bf16.mxu0 %v4939_v38  ;;  %v5009_v37 = vld [vmem:[#allocation13 + $0x28] ss:$16 sps:$4 sm:$0xff]   ;;  %v5017_v38 = vld [vmem:[#allocation13 + $0x4c] ss:$16 sps:$4 sm:$0xff]  }
 0x4c6   :  { %2527 = vmatpush1.bf16.msra.mxu1 %v4934_v13  ;;  %2609 = vmatpush1.bf16.msra.mxu0 %v4937_v39  ;;  %v5012_v13 = vld [vmem:[#allocation13 + $0x40] ss:$16 sps:$4 sm:$0xff]   ;;  %v5015_v39 = vld [vmem:[#allocation13 + $0x48] ss:$16 sps:$4 sm:$0xff]  }
 0x4c7   :  { %2528 = vmatprep.subr.bf16.mxu1 %v4942_v40  ;;  %2610 = vmatprep.subr.bf16.mxu0 %v4945_v41  ;;  %v5020_v40 = vld [vmem:[#allocation13 + $0x64] ss:$16 sps:$4 sm:$0xff]   ;;  %v5023_v41 = vld [vmem:[#allocation13 + $0x6c] ss:$16 sps:$4 sm:$0xff]  }
 0x4ca   :  { %2529 = vmatpush1.bf16.msra.mxu1 %v4940_v42  ;;  %2611 = vmatpush1.bf16.msra.mxu0 %v4943_v43  ;;  %v5018_v42 = vld [vmem:[#allocation13 + $0x60] ss:$16 sps:$4 sm:$0xff]   ;;  %v5021_v43 = vld [vmem:[#allocation13 + $0x68] ss:$16 sps:$4 sm:$0xff]  }
 0x4cb   :  { %2530 = vmatprep.subr.bf16.mxu1 %v4948_v44  ;;  %2612 = vmatprep.subr.bf16.mxu0 %v4951_v45  ;;  %v5026_v44 = vld [vmem:[#allocation13 + $0x84] ss:$16 sps:$4 sm:$0xff]   ;;  %v5029_v45 = vld [vmem:[#allocation13 + $0x8c] ss:$16 sps:$4 sm:$0xff]  }
 0x4ce   :  { %2531 = vmatpush1.bf16.msra.mxu1 %v4946_v46  ;;  %2613 = vmatpush1.bf16.msra.mxu0 %v4949_v47  ;;  %v5024_v46 = vld [vmem:[#allocation13 + $0x80] ss:$16 sps:$4 sm:$0xff]   ;;  %v5027_v47 = vld [vmem:[#allocation13 + $0x88] ss:$16 sps:$4 sm:$0xff]  }
 0x4cf   :  { %2532 = vmatprep.subr.bf16.mxu1 %v4954_v48  ;;  %2614 = vmatprep.subr.bf16.mxu0 %v4957_v49  ;;  %v5035_v48 = vld [vmem:[#allocation13 + $0xac] ss:$16 sps:$4 sm:$0xff]   ;;  %v5030_v49 = vld [vmem:[#allocation13 + $0xa0] ss:$16 sps:$4 sm:$0xff]  }
 0x4d2   :  { %2533 = vmatpush1.bf16.msra.mxu1 %v4952_v51  ;;  %2615 = vmatpush1.bf16.msra.mxu0 %v4955_v52  ;;  %v5038_v51 = vld [vmem:[#allocation13 + $0xc4] ss:$16 sps:$4 sm:$0xff]   ;;  %v5041_v52 = vld [vmem:[#allocation13 + $0xcc] ss:$16 sps:$4 sm:$0xff]  }
 0x4d3   :  { %2534 = vmatprep.subr.bf16.mxu1 %v4960_v53  ;;  %2616 = vmatprep.subr.bf16.mxu0 %v4963_v54  ;;  %v5036_v53 = vld [vmem:[#allocation13 + $0xc0] ss:$16 sps:$4 sm:$0xff]   ;;  %v5039_v54 = vld [vmem:[#allocation13 + $0xc8] ss:$16 sps:$4 sm:$0xff]  }
 0x4d6   :  { %2535 = vmatpush1.bf16.msra.mxu1 %v4958_v56  ;;  %2617 = vmatpush1.bf16.msra.mxu0 %v4961_v57  ;;  %v5047_v56 = vld [vmem:[#allocation13 + $0xec] ss:$16 sps:$4 sm:$0xff]   ;;  %v5042_v57 = vld [vmem:[#allocation13 + $0xe0] ss:$16 sps:$4 sm:$0xff]  }
 0x4d7   :  { %2536 = vmatprep.subr.bf16.mxu1 %v4966_v58  ;;  %2618 = vmatprep.subr.bf16.mxu0 %v4969_v59  ;;  %v5045_v58 = vld [vmem:[#allocation13 + $0xe8] ss:$16 sps:$4 sm:$0xff]   ;;  %v5050_v59 = vld [vmem:[#allocation13 + $0x104] ss:$16 sps:$4 sm:$0xff]  }
 0x4da   :  { %2537 = vmatpush1.bf16.msra.mxu1 %v4964_v61  ;;  %2619 = vmatpush1.bf16.msra.mxu0 %v4967_v62  ;;  %v5048_v61 = vld [vmem:[#allocation13 + $0x100] ss:$16 sps:$4 sm:$0xff]   ;;  %v5051_v62 = vld [vmem:[#allocation13 + $0x108] ss:$16 sps:$4 sm:$0xff]  }
 0x4db   :  { %2538 = vmatprep.subr.bf16.mxu1 %v4972_v63  ;;  %2620 = vmatprep.subr.bf16.mxu0 %v4975_v1  ;;  %v5056_v63 = vld [vmem:[#allocation13 + $0x124] ss:$16 sps:$4 sm:$0xff]   ;;  %v5059_v1 = vld [vmem:[#allocation13 + $0x12c] ss:$16 sps:$4 sm:$0xff]  }
 0x4de   :  { %2539 = vmatpush1.bf16.msra.mxu1 %v4970_v2  ;;  %2621 = vmatpush1.bf16.msra.mxu0 %v4973_v3  ;;  %v5054_v2 = vld [vmem:[#allocation13 + $0x120] ss:$16 sps:$4 sm:$0xff]   ;;  %v5057_v3 = vld [vmem:[#allocation13 + $0x128] ss:$16 sps:$4 sm:$0xff]  }
 0x4df   :  { %2540 = vmatprep.subr.bf16.mxu1 %v4978_v4  ;;  %2622 = vmatprep.subr.bf16.mxu0 %v4981_v5  ;;  %v5062_v4 = vld [vmem:[#allocation13 + $0x144] ss:$16 sps:$4 sm:$0xff]   ;;  %v5065_v5 = vld [vmem:[#allocation13 + $0x14c] ss:$16 sps:$4 sm:$0xff]  }
 0x4e2   :  { %2541 = vmatpush1.bf16.msra.mxu1 %v4976_v6  ;;  %2623 = vmatpush1.bf16.msra.mxu0 %v4979_v7  ;;  %v5060_v6 = vld [vmem:[#allocation13 + $0x140] ss:$16 sps:$4 sm:$0xff]   ;;  %v5063_v7 = vld [vmem:[#allocation13 + $0x148] ss:$16 sps:$4 sm:$0xff]  }
 0x4e3   :  { %2542 = vmatprep.subr.bf16.mxu1 %v4984_v8  ;;  %2624 = vmatprep.subr.bf16.mxu0 %v4987_v9  ;;  %v5068_v8 = vld [vmem:[#allocation13 + $0x164] ss:$16 sps:$4 sm:$0xff]   ;;  %v5071_v9 = vld [vmem:[#allocation13 + $0x16c] ss:$16 sps:$4 sm:$0xff]  }
 0x4e6   :  { %2543 = vmatpush1.bf16.msra.mxu1 %v4982_v10  ;;  %2625 = vmatpush1.bf16.msra.mxu0 %v4985_v0  ;;  %v5066_v10 = vld [vmem:[#allocation13 + $0x160] ss:$16 sps:$4 sm:$0xff]   ;;  %v5069_v0 = vld [vmem:[#allocation13 + $0x168] ss:$16 sps:$4 sm:$0xff]  }
 0x4e7   :  { %2544 = vmatprep.subr.bf16.mxu1 %v4990_v12  ;;  %2626 = vmatprep.subr.bf16.mxu0 %v4993_v14  ;;  %v5074_v12 = vld [vmem:[#allocation13 + $0x184] ss:$16 sps:$4 sm:$0xff]   ;;  %v5077_v14 = vld [vmem:[#allocation13 + $0x18c] ss:$16 sps:$4 sm:$0xff]  }
 0x4ea   :  { %2545 = vmatpush1.bf16.msra.mxu1 %v4988_v18  ;;  %2627 = vmatpush1.bf16.msra.mxu0 %v4991_v21  ;;  %v5075_v18 = vld [vmem:[#allocation13 + $0x188] ss:$16 sps:$4 sm:$0xff]   ;;  %v5080_v21 = vld [vmem:[#allocation13 + $0x1a4] ss:$16 sps:$4 sm:$0xff]  }
 0x4eb   :  { %2546 = vmatprep.subr.bf16.mxu1 %v4996_v23  ;;  %2628 = vmatprep.subr.bf16.mxu0 %v4999_v25  ;;  %v5078_v23 = vld [vmem:[#allocation13 + $0x1a0] ss:$16 sps:$4 sm:$0xff]   ;;  %v5081_v25 = vld [vmem:[#allocation13 + $0x1a8] ss:$16 sps:$4 sm:$0xff]  }
 0x4ee   :  { %2547 = vmatpush1.bf16.msra.mxu1 %v4994_v26  ;;  %2629 = vmatpush1.bf16.msra.mxu0 %v4997_v27  ;;  %v5086_v26 = vld [vmem:[#allocation13 + $0x1c4] ss:$16 sps:$4 sm:$0xff]   ;;  %v5089_v27 = vld [vmem:[#allocation13 + $0x1cc] ss:$16 sps:$4 sm:$0xff]  }
 0x4ef   :  { %3469 = vmatprep.subr.bf16.mxu1 %v5002_v29  ;;  %3551 = vmatprep.subr.bf16.mxu0 %v5005_v30  ;;  %v5087_v29 = vld [vmem:[#allocation13 + $0x1c8] ss:$16 sps:$4 sm:$0xff]   ;;  %v5092_v30 = vld [vmem:[#allocation13 + $0x1e4] ss:$16 sps:$4 sm:$0xff]  }
 0x4f1   :  { %2549 = vmatmul.mubr.bf16.vlgmr.msra.gmra.mrb[12].mxu1 %v1683_v32  ;;  %2631 = vmatmul.mubr.bf16.vlgmr.msra.gmra.mrb[16].mxu0 %v1683_v32  ;;  %v5093_v32 = vld [vmem:[#allocation13 + $0x1e8] ss:$16 sps:$4 sm:$0xff]  }
 0x4f2   :  { %3470 = vmatpush1.bf16.msra.mxu1 %v5000_v31  ;;  %3552 = vmatpush1.bf16.msra.mxu0 %v5003_v36  ;;  %v5095_v31 = vld [vmem:[#allocation13 + $0x1ec] ss:$16 sps:$4 sm:$0xff]   ;;  %v5090_v36 = vld [vmem:[#allocation13 + $0x1e0] ss:$16 sps:$4 sm:$0xff]  }
 0x4f3   :  { %3471 = vmatprep.subr.bf16.mxu1 %v5008_v33  ;;  %3553 = vmatprep.subr.bf16.mxu0 %v5011_v34  ;;  %v5098_v33 = vld [vmem:[#allocation13 + $0x204] ss:$16 sps:$4 sm:$0xff]   ;;  %v5101_v34 = vld [vmem:[#allocation13 + $0x20c] ss:$16 sps:$4 sm:$0xff]  }
 0x4f6   :  { %3472 = vmatpush1.bf16.msra.mxu1 %v5006_v35  ;;  %3554 = vmatpush1.bf16.msra.mxu0 %v5009_v37  ;;  %v5828_v35 = vld [vmem:[%s5879_s12] sm:$0xf] }
 0x4f7   :  { %3473 = vmatprep.subr.bf16.mxu1 %v5014_v24  ;;  %3555 = vmatprep.subr.bf16.mxu0 %v5017_v38  ;;  %v1818_v37 = vrot.slane %v5828_v35, %v5786_v16  ;;  %v1822_v24 = vrot.slane %v5828_v35, %v5793_v19  ;;  %v1830_v38 = vrot.slane %v5828_v35, %v5795_v20 }
 0x4fa   :  { %3474 = vmatpush1.bf16.msra.mxu1 %v5012_v13  ;;  %3556 = vmatpush1.bf16.msra.mxu0 %v5015_v39 }
 0x4fb   :  { %3475 = vmatprep.subr.bf16.mxu1 %v5020_v40  ;;  %3557 = vmatprep.subr.bf16.mxu0 %v5023_v41 }
 0x4fe   :  { %3476 = vmatpush1.bf16.msra.mxu1 %v5018_v42  ;;  %3558 = vmatpush1.bf16.msra.mxu0 %v5021_v43 }
 0x4ff   :  { %3477 = vmatprep.subr.bf16.mxu1 %v5026_v44  ;;  %3559 = vmatprep.subr.bf16.mxu0 %v5029_v45 }
 0x502   :  { %3478 = vmatpush1.bf16.msra.mxu1 %v5024_v46  ;;  %3560 = vmatpush1.bf16.msra.mxu0 %v5027_v47 }
 0x503   :  { %3479 = vmatprep.subr.bf16.mxu1 %v5032_v11  ;;  %3561 = vmatprep.subr.bf16.mxu0 %v5035_v48 }
 0x506   :  { %3480 = vmatpush1.bf16.msra.mxu1 %v5030_v49  ;;  %3562 = vmatpush1.bf16.msra.mxu0 %v5033_v50 }
 0x507   :  { %3481 = vmatprep.subr.bf16.mxu1 %v5038_v51  ;;  %3563 = vmatprep.subr.bf16.mxu0 %v5041_v52 }
 0x50a   :  { %3482 = vmatpush1.bf16.msra.mxu1 %v5036_v53  ;;  %3564 = vmatpush1.bf16.msra.mxu0 %v5039_v54 }
 0x50b   :  { %3483 = vmatprep.subr.bf16.mxu1 %v5044_v55  ;;  %3565 = vmatprep.subr.bf16.mxu0 %v5047_v56 }
 0x50e   :  { %3484 = vmatpush1.bf16.msra.mxu1 %v5042_v57  ;;  %3566 = vmatpush1.bf16.msra.mxu0 %v5045_v58 }
 0x50f   :  { %3485 = vmatprep.subr.bf16.mxu1 %v5050_v59  ;;  %3567 = vmatprep.subr.bf16.mxu0 %v5053_v60 }
 0x512   :  { %3486 = vmatpush1.bf16.msra.mxu1 %v5048_v61  ;;  %3568 = vmatpush1.bf16.msra.mxu0 %v5051_v62 }
 0x513   :  { %3487 = vmatprep.subr.bf16.mxu1 %v5056_v63  ;;  %3569 = vmatprep.subr.bf16.mxu0 %v5059_v1 }
 0x516   :  { %3488 = vmatpush1.bf16.msra.mxu1 %v5054_v2  ;;  %3570 = vmatpush1.bf16.msra.mxu0 %v5057_v3 }
 0x517   :  { %3489 = vmatprep.subr.bf16.mxu1 %v5062_v4  ;;  %3571 = vmatprep.subr.bf16.mxu0 %v5065_v5 }
 0x51a   :  { %3490 = vmatpush1.bf16.msra.mxu1 %v5060_v6  ;;  %3572 = vmatpush1.bf16.msra.mxu0 %v5063_v7 }
 0x51b   :  { %3491 = vmatprep.subr.bf16.mxu1 %v5068_v8  ;;  %3573 = vmatprep.subr.bf16.mxu0 %v5071_v9 }
 0x51e   :  { %3492 = vmatpush1.bf16.msra.mxu1 %v5066_v10  ;;  %3574 = vmatpush1.bf16.msra.mxu0 %v5069_v0 }
 0x51f   :  { %3493 = vmatprep.subr.bf16.mxu1 %v5074_v12  ;;  %3575 = vmatprep.subr.bf16.mxu0 %v5077_v14  ;;  %v5096_v14 = vld [vmem:[#allocation13 + $0x200] ss:$16 sps:$4 sm:$0xff]  }
 0x522   :  { %3494 = vmatpush1.bf16.msra.mxu1 %v5072_v15  ;;  %3576 = vmatpush1.bf16.msra.mxu0 %v5075_v18  ;;  %v5099_v15 = vld [vmem:[#allocation13 + $0x208] ss:$16 sps:$4 sm:$0xff]  }
 0x523   :  { %3495 = vmatprep.subr.bf16.mxu1 %v5080_v21  ;;  %3577 = vmatprep.subr.bf16.mxu0 %v5083_v22  ;;  %v5104_v21 = vld [vmem:[#allocation13 + $0x224] ss:$16 sps:$4 sm:$0xff]   ;;  %v5107_v22 = vld [vmem:[#allocation13 + $0x22c] ss:$16 sps:$4 sm:$0xff]  }
 0x526   :  { %3496 = vmatpush1.bf16.msra.mxu1 %v5078_v23  ;;  %3578 = vmatpush1.bf16.msra.mxu0 %v5081_v25  ;;  %v1826_v23 = vrot.slane %v5828_v35, %v5788_v17  ;;  %v5114_v35 = vld [vmem:[#allocation13 + $0x260] ss:$16 sps:$4 sm:$0xff]  }
 0x527   :  { %3497 = vmatprep.subr.bf16.mxu1 %v5086_v26  ;;  %3579 = vmatprep.subr.bf16.mxu0 %v5089_v27  ;;  %v5102_v26 = vld [vmem:[#allocation13 + $0x220] ss:$16 sps:$4 sm:$0xff]   ;;  %v5105_v27 = vld [vmem:[#allocation13 + $0x228] ss:$16 sps:$4 sm:$0xff]  }
 0x52a   :  { %3498 = vmatpush1.bf16.msra.mxu1 %v5084_v28  ;;  %3580 = vmatpush1.bf16.msra.mxu0 %v5087_v29  ;;  %v5110_v28 = vld [vmem:[#allocation13 + $0x244] ss:$16 sps:$4 sm:$0xff]   ;;  %v5113_v29 = vld [vmem:[#allocation13 + $0x24c] ss:$16 sps:$4 sm:$0xff]  }
 0x52b   :  { %3499 = vmatprep.subr.bf16.mxu1 %v5092_v30  ;;  %3581 = vmatprep.subr.bf16.mxu0 %v5095_v31  ;;  %v5108_v31 = vld [vmem:[#allocation13 + $0x240] ss:$16 sps:$4 sm:$0xff]  }
 0x52e   :  { %3500 = vmatpush1.bf16.msra.mxu1 %v5090_v36  ;;  %3582 = vmatpush1.bf16.msra.mxu0 %v5093_v32  ;;  %v5111_v36 = vld [vmem:[#allocation13 + $0x248] ss:$16 sps:$4 sm:$0xff]   ;;  %v5116_v32 = vld [vmem:[#allocation13 + $0x264] ss:$16 sps:$4 sm:$0xff]  }
 0x52f   :  { %3510 = vmatprep.subr.bf16.mxu1 %v5098_v33  ;;  %3592 = vmatprep.subr.bf16.mxu0 %v5101_v34  ;;  %v5119_v33 = vld [vmem:[#allocation13 + $0x26c] ss:$16 sps:$4 sm:$0xff]  }
 0x5c4   :  { %v2550_v13 = vpop.f32.mrb[12].mxu1  ;;  %v5836_v39 = vpop.f32.mrb[16].mxu0 }
 0x5c5   :  { %v4538_v40 = vadd.f32 %v2550_v13, %v1818_v37  ;;  %v2552_v41 = vpop.f32.mrb[13].mxu1  ;;  %v2634_v42 = vpop.f32.mrb[17].mxu0  ;;  %v5841_v30 = vadd.f32 %v5836_v39, %v1826_v23  ;;  %v5117_v37 = vld [vmem:[#allocation13 + $0x268] ss:$16 sps:$4 sm:$0xff]   ;;  %v5120_v39 = vld [vmem:[#allocation13 + $0x280] ss:$16 sps:$4 sm:$0xff]  }
 0x5c6   :  { %v4539_v43 = vadd.f32 %v2552_v41, %v1822_v24  ;;  %v4541_v44 = vadd.f32 %v2634_v42, %v1830_v38  ;;  %v2554_v45 = vpop.f32.mrb[14].mxu1  ;;  %v2636_v46 = vpop.f32.mrb[18].mxu0  ;;  %v5122_v24 = vld [vmem:[#allocation13 + $0x284] ss:$16 sps:$4 sm:$0xff]   ;;  %v5125_v38 = vld [vmem:[#allocation13 + $0x28c] ss:$16 sps:$4 sm:$0xff]  }
 0x5c7   :  { %v2639_v47 = vmin.f32 %v4538_v40, 20.0  ;;  %v2555_v11 = vpop.f32.mrb[15].mxu1  ;;  %v2637_v48 = vpop.f32.mrb[19].mxu0  ;;  %v2641_v34 = vmin.f32 %v5841_v30, 20.0  ;;  %v5128_v41 = vld [vmem:[#allocation13 + $0x2a4] ss:$16 sps:$4 sm:$0xff]  }
 0x5c8   :  { %v2640_v49 = vmin.f32 %v4539_v43, 20.0  ;;  %v2642_v50 = vmin.f32 %v4541_v44, 20.0  ;;  %v5131_v42 = vld [vmem:[#allocation13 + $0x2ac] ss:$16 sps:$4 sm:$0xff]   ;;  %v5134_v45 = vld [vmem:[#allocation13 + $0x2c4] ss:$16 sps:$4 sm:$0xff]  }
 0x5c9   :  { %v2643_v51 = vmul.f32 1.442695, %v2639_v47  ;;  %v2647_v13 = vmul.f32 1.442695, %v2641_v34  ;;  %v5137_v46 = vld [vmem:[#allocation13 + $0x2cc] ss:$16 sps:$4 sm:$0xff]  }
 0x5ca   :  { %v2645_v52 = vmul.f32 1.442695, %v2640_v49  ;;  %v2649_v53 = vmul.f32 1.442695, %v2642_v50  ;;  %v5132_v47 = vld [vmem:[#allocation13 + $0x2c0] ss:$16 sps:$4 sm:$0xff]  }
 0x5cb   :  { %5264 = vpow2.f32 %v2643_v51  ;;  %v5135_v11 = vld [vmem:[#allocation13 + $0x2c8] ss:$16 sps:$4 sm:$0xff]   ;;  %v5140_v48 = vld [vmem:[#allocation13 + $0x2e4] ss:$16 sps:$4 sm:$0xff]   ;;  %v5143_v49 = vld [vmem:[#allocation13 + $0x2ec] ss:$16 sps:$4 sm:$0xff]  }
 0x5cc   :  { %5266 = vpow2.f32 %v2645_v52  ;;  %v5138_v50 = vld [vmem:[#allocation13 + $0x2e0] ss:$16 sps:$4 sm:$0xff]   ;;  %v5141_v51 = vld [vmem:[#allocation13 + $0x2e8] ss:$16 sps:$4 sm:$0xff]   ;;  %v5185_v23 = vld [vmem:[#allocation13 + $0x3cc] ss:$16 sps:$4 sm:$0xff]  }
 0x5cd   :  { %5268 = vpow2.f32 %v2649_v53  ;;  %v5146_v53 = vld [vmem:[#allocation13 + $0x304] ss:$16 sps:$4 sm:$0xff]  }
 0x5d5   :  { %v5265_v54 = vpop.eup %5264 }
 0x5d6   :  { %v2651_v55 = vadd.f32 2.0, %v5265_v54  ;;  %v5267_v56 = vpop.eup %5266 }
 0x5d7   :  { %v5269_v57 = vpop.eup %5268  ;;  %v2652_v59 = vadd.f32 2.0, %v5267_v56 }
 0x5d8   :  { %v2655_v58 = vmul.f32 %v5265_v54, %v2651_v55  ;;  %v2654_v60 = vadd.f32 2.0, %v5269_v57  ;;  %v5149_v54 = vld [vmem:[#allocation13 + $0x30c] ss:$16 sps:$4 sm:$0xff]  }
 0x5d9   :  { %v2656_v62 = vmul.f32 %v5267_v56, %v2652_v59  ;;  %v5144_v56 = vld [vmem:[#allocation13 + $0x300] ss:$16 sps:$4 sm:$0xff]   ;;  %v5155_v59 = vld [vmem:[#allocation13 + $0x32c] ss:$16 sps:$4 sm:$0xff]  }
 0x5da   :  { %v2659_v61 = vadd.f32 2.0, %v2655_v58  ;;  %v2658_v63 = vmul.f32 %v5269_v57, %v2654_v60  ;;  %v5147_v57 = vld [vmem:[#allocation13 + $0x308] ss:$16 sps:$4 sm:$0xff]  }
 0x5db   :  { %v2660_v1 = vadd.f32 2.0, %v2656_v62 }
 0x5dc   :  { %5270 = vrcp.f32 %v2659_v61  ;;  %v2662_v2 = vadd.f32 2.0, %v2658_v63  ;;  %v5150_v61 = vld [vmem:[#allocation13 + $0x320] ss:$16 sps:$4 sm:$0xff]  }
 0x5dd   :  { %5272 = vrcp.f32 %v2660_v1  ;;  %v5161_v1 = vld [vmem:[#allocation13 + $0x34c] ss:$16 sps:$4 sm:$0xff]  }
 0x5de   :  { %5274 = vrcp.f32 %v2662_v2 }
 0x5df   :  { %5276 = vpow2.f32 %v2647_v13  ;;  %v5196_v13 = vld [vmem:[#allocation14 + $0x48] sm:$0xff]  }
 0x5e6   :  { %v5271_v3 = vpop.eup %5270 }
 0x5e7   :  { %v2667_v4 = vmul.f32 %v5271_v3, %v2655_v58  ;;  %v5273_v5 = vpop.eup %5272  ;;  %v5152_v58 = vld [vmem:[#allocation13 + $0x324] ss:$16 sps:$4 sm:$0xff]   ;;  %v5156_v3 = vld [vmem:[#allocation13 + $0x340] ss:$16 sps:$4 sm:$0xff]  }
 0x5e8   :  { %v5275_v6 = vpop.eup %5274  ;;  %v2668_v7 = vmul.f32 %v5273_v5, %v2656_v62  ;;  %v5153_v62 = vld [vmem:[#allocation13 + $0x328] ss:$16 sps:$4 sm:$0xff]   ;;  %v5164_v5 = vld [vmem:[#allocation13 + $0x364] ss:$16 sps:$4 sm:$0xff]  }
 0x5e9   :  { %v2671_v8 = vmul.f32 %v4538_v40, %v2667_v4  ;;  %v2670_v9 = vmul.f32 %v5275_v6, %v2658_v63  ;;  %v5123_v40 = vld [vmem:[#allocation13 + $0x288] ss:$16 sps:$4 sm:$0xff]   ;;  %v5277_v52 = vpop.eup %5276  ;;  %v5158_v63 = vld [vmem:[#allocation13 + $0x344] ss:$16 sps:$4 sm:$0xff]   ;;  %v5167_v6 = vld [vmem:[#allocation13 + $0x36c] ss:$16 sps:$4 sm:$0xff]  }
 0x5ea   :  { %v2672_v10 = vmul.f32 %v4539_v43, %v2668_v7  ;;  %v5126_v43 = vld [vmem:[#allocation13 + $0x2a0] ss:$16 sps:$4 sm:$0xff]   ;;  %v2653_v55 = vadd.f32 2.0, %v5277_v52  ;;  %v5159_v4 = vld [vmem:[#allocation13 + $0x348] ss:$16 sps:$4 sm:$0xff]  }
 0x5eb   :  { %v2674_v0 = vmul.f32 %v4541_v44, %v2670_v9  ;;  %v2675_v18 = vpack.c.bf16 %v2671_v8, %v2671_v8  ;;  %v5129_v44 = vld [vmem:[#allocation13 + $0x2a8] ss:$16 sps:$4 sm:$0xff]   ;;  %v5162_v7 = vld [vmem:[#allocation13 + $0x360] ss:$16 sps:$4 sm:$0xff]   ;;  %v5170_v9 = vld [vmem:[#allocation13 + $0x384] ss:$16 sps:$4 sm:$0xff]  }
 0x5ec   :  { %v2676_v12 = vpack.c.bf16 %v2672_v10, %v2672_v10  ;;  %v2657_v60 = vmul.f32 %v5277_v52, %v2653_v55  ;;  %v5165_v8 = vld [vmem:[#allocation13 + $0x368] ss:$16 sps:$4 sm:$0xff]   ;;  %v5173_v10 = vld [vmem:[#allocation13 + $0x38c] ss:$16 sps:$4 sm:$0xff]  }
 0x5ed   :  { %v2678_v25 = vpack.c.bf16 %v2674_v0, %v2674_v0  ;;  %v5168_v0 = vld [vmem:[#allocation13 + $0x380] ss:$16 sps:$4 sm:$0xff]   ;;  %v5212_v52 = vld [vmem:[#allocation14 + $0x68] sm:$0xff]  }
 0x5ee   :  { %3501 = vmatprep.mubr.bf16.mxu1 %v2676_v12  ;;  %3583 = vmatprep.mubr.bf16.mxu0 %v2676_v12  ;;  %v2661_v2 = vadd.f32 2.0, %v2657_v60  ;;  %v5171_v12 = vld [vmem:[#allocation13 + $0x388] ss:$16 sps:$4 sm:$0xff]  }
 0x5ef   :  { %3502 = vmatmul.mubr.bf16.vlgmr.msra.gmra.mrb[16].mxu1 %v2675_v18  ;;  %3584 = vmatmul.mubr.bf16.vlgmr.msra.gmra.mrb[20].mxu0 %v2675_v18  ;;  %v5174_v18 = vld [vmem:[#allocation13 + $0x3a0] ss:$16 sps:$4 sm:$0xff]   ;;  %v5215_v55 = vld [vmem:[#allocation14 + $0xa8] sm:$0xff]  }
 0x5f0   :  { %3511 = vmatpush1.bf16.msra.mxu1 %v5096_v14  ;;  %3593 = vmatpush1.bf16.msra.mxu0 %v5099_v15  ;;  %5278 = vrcp.f32 %v2661_v2  ;;  %v5176_v14 = vld [vmem:[#allocation13 + $0x3a4] ss:$16 sps:$4 sm:$0xff]   ;;  %v5179_v15 = vld [vmem:[#allocation13 + $0x3ac] ss:$16 sps:$4 sm:$0xff]  }
 0x5f1   :  { %3542 = vmatprep.mubr.bf16.mxu1 %v2678_v25  ;;  %3624 = vmatprep.mubr.bf16.mxu0 %v2678_v25 }
 0x5f2   :  { %3512 = vmatprep.subr.bf16.mxu1 %v5104_v21  ;;  %3594 = vmatprep.subr.bf16.mxu0 %v5107_v22  ;;  %v5177_v21 = vld [vmem:[#allocation13 + $0x3a8] ss:$16 sps:$4 sm:$0xff]   ;;  %v5182_v22 = vld [vmem:[#allocation13 + $0x3c4] ss:$16 sps:$4 sm:$0xff]  }
 0x5f4   :  { %3513 = vmatpush1.bf16.msra.mxu1 %v5102_v26  ;;  %3595 = vmatpush1.bf16.msra.mxu0 %v5105_v27  ;;  %v5180_v26 = vld [vmem:[#allocation13 + $0x3c0] ss:$16 sps:$4 sm:$0xff]   ;;  %v5183_v27 = vld [vmem:[#allocation13 + $0x3c8] ss:$16 sps:$4 sm:$0xff]  }
 0x5f5   :  { %3514 = vmatprep.subr.bf16.mxu1 %v5110_v28  ;;  %3596 = vmatprep.subr.bf16.mxu0 %v5113_v29  ;;  %v5188_v29 = vld [vmem:[#allocation13 + $0x3e4] ss:$16 sps:$4 sm:$0xff]  }
 0x5f8   :  { %3515 = vmatpush1.bf16.msra.mxu1 %v5108_v31  ;;  %3597 = vmatpush1.bf16.msra.mxu0 %v5111_v36  ;;  %v5191_v31 = vld [vmem:[#allocation13 + $0x3ec] ss:$16 sps:$4 sm:$0xff]   ;;  %v5186_v36 = vld [vmem:[#allocation13 + $0x3e0] ss:$16 sps:$4 sm:$0xff]  }
 0x5f9   :  { %3516 = vmatprep.subr.bf16.mxu1 %v5116_v32  ;;  %3598 = vmatprep.subr.bf16.mxu0 %v5119_v33  ;;  %v5189_v32 = vld [vmem:[#allocation13 + $0x3e8] ss:$16 sps:$4 sm:$0xff]  }
 0x5fa   :  { %v5279_v25 = vpop.eup %5278 }
 0x5fb   :  { %v2669_v28 = vmul.f32 %v5279_v25, %v2657_v60  ;;  %v5220_v60 = vld [vmem:[#allocation14 + $0x78] sm:$0xff]  }
 0x5fc   :  { %3517 = vmatpush1.bf16.msra.mxu1 %v5114_v35  ;;  %3599 = vmatpush1.bf16.msra.mxu0 %v5117_v37  ;;  %v5192_v35 = vld [vmem:[#allocation14 + $0x40] sm:$0xff]  }
 0x5fd   :  { %3518 = vmatprep.subr.bf16.mxu1 %v5122_v24  ;;  %3600 = vmatprep.subr.bf16.mxu0 %v5125_v38  ;;  %v2673_v33 = vmul.f32 %v5841_v30, %v2669_v28  ;;  %v5193_v37 = vld [vmem:[#allocation14 + $0xc0] sm:$0xff]   ;;  %v5200_v30 = vld [vmem:[#allocation14 + $0x50] sm:$0xff]  }
 0x5fe   :  { %v5194_v24 = vld [vmem:[#allocation14] sm:$0xff]  }
 0x5ff   :  { %v2677_v34 = vpack.c.bf16 %v2673_v33, %v2673_v33  ;;  %v5195_v38 = vld [vmem:[#allocation14 + $0x80] sm:$0xff]  }
 0x600   :  { %3519 = vmatpush1.bf16.msra.mxu1 %v5120_v39  ;;  %3601 = vmatpush1.bf16.msra.mxu0 %v5123_v40  ;;  %v5197_v39 = vld [vmem:[#allocation14 + $0xc8] sm:$0xff]  }
 0x601   :  { %3520 = vmatprep.subr.bf16.mxu1 %v5128_v41  ;;  %3602 = vmatprep.subr.bf16.mxu0 %v5131_v42  ;;  %v5198_v40 = vld [vmem:[#allocation14 + $0x8] sm:$0xff]   ;;  %v5201_v42 = vld [vmem:[#allocation14 + $0xd0] sm:$0xff]  }
 0x602   :  { %v5199_v41 = vld [vmem:[#allocation14 + $0x88] sm:$0xff]  }
 0x604   :  { %3521 = vmatpush1.bf16.msra.mxu1 %v5126_v43  ;;  %3603 = vmatpush1.bf16.msra.mxu0 %v5129_v44  ;;  %v5202_v43 = vld [vmem:[#allocation14 + $0x10] sm:$0xff]  }
 0x605   :  { %3522 = vmatprep.subr.bf16.mxu1 %v5134_v45  ;;  %3604 = vmatprep.subr.bf16.mxu0 %v5137_v46  ;;  %v5203_v44 = vld [vmem:[#allocation14 + $0x90] sm:$0xff]   ;;  %v5204_v45 = vld [vmem:[#allocation14 + $0x58] sm:$0xff]  }
 0x606   :  { %v5205_v46 = vld [vmem:[#allocation14 + $0xd8] sm:$0xff]  }
 0x608   :  { %3523 = vmatpush1.bf16.msra.mxu1 %v5132_v47  ;;  %3605 = vmatpush1.bf16.msra.mxu0 %v5135_v11  ;;  %v5206_v47 = vld [vmem:[#allocation14 + $0x18] sm:$0xff]  }
 0x609   :  { %3524 = vmatprep.subr.bf16.mxu1 %v5140_v48  ;;  %3606 = vmatprep.subr.bf16.mxu0 %v5143_v49  ;;  %v5207_v11 = vld [vmem:[#allocation14 + $0x98] sm:$0xff]   ;;  %v5208_v48 = vld [vmem:[#allocation14 + $0x60] sm:$0xff]  }
 0x60a   :  { %v5209_v49 = vld [vmem:[#allocation14 + $0xe0] sm:$0xff]  }
 0x60c   :  { %3525 = vmatpush1.bf16.msra.mxu1 %v5138_v50  ;;  %3607 = vmatpush1.bf16.msra.mxu0 %v5141_v51  ;;  %v5210_v50 = vld [vmem:[#allocation14 + $0x20] sm:$0xff]  }
 0x60d   :  { %3526 = vmatprep.subr.bf16.mxu1 %v5146_v53  ;;  %3608 = vmatprep.subr.bf16.mxu0 %v5149_v54  ;;  %v5211_v51 = vld [vmem:[#allocation14 + $0xa0] sm:$0xff]   ;;  %v5213_v53 = vld [vmem:[#allocation14 + $0xe8] sm:$0xff]  }
 0x60e   :  { %v5214_v54 = vld [vmem:[#allocation14 + $0x28] sm:$0xff]  }
 0x610   :  { %3527 = vmatpush1.bf16.msra.mxu1 %v5144_v56  ;;  %3609 = vmatpush1.bf16.msra.mxu0 %v5147_v57  ;;  %v5216_v56 = vld [vmem:[#allocation14 + $0x70] sm:$0xff]  }
 0x611   :  { %3528 = vmatprep.subr.bf16.mxu1 %v5152_v58  ;;  %3610 = vmatprep.subr.bf16.mxu0 %v5155_v59  ;;  %v5217_v57 = vld [vmem:[#allocation14 + $0xf0] sm:$0xff]  }
 0x612   :  { %v5218_v58 = vld [vmem:[#allocation14 + $0x30] sm:$0xff]  }
 0x613   :  { %v5219_v59 = vld [vmem:[#allocation14 + $0xb0] sm:$0xff]  }
 0x614   :  { %3529 = vmatpush1.bf16.msra.mxu1 %v5150_v61  ;;  %3611 = vmatpush1.bf16.msra.mxu0 %v5153_v62  ;;  %v5221_v61 = vld [vmem:[#allocation14 + $0xf8] sm:$0xff]  }
 0x615   :  { %3530 = vmatprep.subr.bf16.mxu1 %v5158_v63  ;;  %3612 = vmatprep.subr.bf16.mxu0 %v5161_v1  ;;  %v5222_v62 = vld [vmem:[#allocation14 + $0x38] sm:$0xff]   ;;  %v2807_v1 = vld [vmem:[%s5881_s14] sm:$0xf] }
 0x616   :  { %v5223_v63 = vld [vmem:[#allocation14 + $0xb8] sm:$0xff]   ;;  %v2812_v2 = vrot.slane %v2807_v1, %v5786_v16 }
 0x618   :  { %3531 = vmatpush1.bf16.msra.mxu1 %v5156_v3  ;;  %3613 = vmatpush1.bf16.msra.mxu0 %v5159_v4  ;;  %v2820_v3 = vrot.slane %v2807_v1, %v5788_v17  ;;  %v2816_v4 = vrot.slane %v2807_v1, %v5793_v19 }
 0x619   :  { %3532 = vmatprep.subr.bf16.mxu1 %v5164_v5  ;;  %3614 = vmatprep.subr.bf16.mxu0 %v5167_v6  ;;  %v2824_v5 = vrot.slane %v2807_v1, %v5795_v20 }
 0x61c   :  { %3533 = vmatpush1.bf16.msra.mxu1 %v5162_v7  ;;  %3615 = vmatpush1.bf16.msra.mxu0 %v5165_v8 }
 0x61d   :  { %3534 = vmatprep.subr.bf16.mxu1 %v5170_v9  ;;  %3616 = vmatprep.subr.bf16.mxu0 %v5173_v10 }
 0x620   :  { %3535 = vmatpush1.bf16.msra.mxu1 %v5168_v0  ;;  %3617 = vmatpush1.bf16.msra.mxu0 %v5171_v12 }
 0x621   :  { %3536 = vmatprep.subr.bf16.mxu1 %v5176_v14  ;;  %3618 = vmatprep.subr.bf16.mxu0 %v5179_v15 }
 0x624   :  { %3537 = vmatpush1.bf16.msra.mxu1 %v5174_v18  ;;  %3619 = vmatpush1.bf16.msra.mxu0 %v5177_v21 }
 0x625   :  { %3538 = vmatprep.subr.bf16.mxu1 %v5182_v22  ;;  %3620 = vmatprep.subr.bf16.mxu0 %v5185_v23 }
 0x628   :  { %3539 = vmatpush1.bf16.msra.mxu1 %v5180_v26  ;;  %3621 = vmatpush1.bf16.msra.mxu0 %v5183_v27 }
 0x629   :  { %3540 = vmatprep.subr.bf16.mxu1 %v5188_v29  ;;  %3622 = vmatprep.subr.bf16.mxu0 %v5191_v31 }
 0x62c   :  { %3541 = vmatpush1.bf16.msra.mxu1 %v5186_v36  ;;  %3623 = vmatpush1.bf16.msra.mxu0 %v5189_v32 }
 0x62d   :  { %4480 = vmatprep.subr.bf16.mxu1 %v5192_v35  ;;  %4502 = vmatprep.subr.bf16.mxu0 %v5193_v37 }
 0x62f   :  { %3543 = vmatmul.mubr.bf16.vlgmr.msra.gmra.mrb[16].mxu1 %v2677_v34  ;;  %3625 = vmatmul.mubr.bf16.vlgmr.msra.gmra.mrb[20].mxu0 %v2677_v34 }
 0x630   :  { %4481 = vmatpush3.bf16.msra.mxu1 %v5194_v24  ;;  %4503 = vmatpush3.bf16.msra.mxu0 %v5195_v38 }
 0x631   :  { %4482 = vmatprep.subr.bf16.mxu1 %v5196_v13  ;;  %4504 = vmatprep.subr.bf16.mxu0 %v5197_v39 }
 0x634   :  { %4483 = vmatpush3.bf16.msra.mxu1 %v5198_v40  ;;  %4505 = vmatpush3.bf16.msra.mxu0 %v5199_v41 }
 0x635   :  { %4484 = vmatprep.subr.bf16.mxu1 %v5200_v30  ;;  %4506 = vmatprep.subr.bf16.mxu0 %v5201_v42 }
 0x638   :  { %4485 = vmatpush3.bf16.msra.mxu1 %v5202_v43  ;;  %4507 = vmatpush3.bf16.msra.mxu0 %v5203_v44 }
 0x639   :  { %4486 = vmatprep.subr.bf16.mxu1 %v5204_v45  ;;  %4508 = vmatprep.subr.bf16.mxu0 %v5205_v46 }
 0x63c   :  { %4487 = vmatpush3.bf16.msra.mxu1 %v5206_v47  ;;  %4509 = vmatpush3.bf16.msra.mxu0 %v5207_v11 }
 0x63d   :  { %4488 = vmatprep.subr.bf16.mxu1 %v5208_v48  ;;  %4510 = vmatprep.subr.bf16.mxu0 %v5209_v49 }
 0x640   :  { %4489 = vmatpush3.bf16.msra.mxu1 %v5210_v50  ;;  %4511 = vmatpush3.bf16.msra.mxu0 %v5211_v51 }
 0x641   :  { %4490 = vmatprep.subr.bf16.mxu1 %v5212_v52  ;;  %4512 = vmatprep.subr.bf16.mxu0 %v5213_v53 }
 0x644   :  { %4491 = vmatpush3.bf16.msra.mxu1 %v5214_v54  ;;  %4513 = vmatpush3.bf16.msra.mxu0 %v5215_v55 }
 0x645   :  { %4492 = vmatprep.subr.bf16.mxu1 %v5216_v56  ;;  %4514 = vmatprep.subr.bf16.mxu0 %v5217_v57 }
 0x648   :  { %4493 = vmatpush3.bf16.msra.mxu1 %v5218_v58  ;;  %4515 = vmatpush3.bf16.msra.mxu0 %v5219_v59  ;;  %v4444_v59 = vld [vmem:[%s5883_s16] ss:$0 sm:$0xff] }
 0x649   :  { %4494 = vmatprep.subr.bf16.mxu1 %v5220_v60  ;;  %4516 = vmatprep.subr.bf16.mxu0 %v5221_v61 }
 0x64c   :  { %4495 = vmatpush3.bf16.msra.mxu1 %v5222_v62  ;;  %4517 = vmatpush3.bf16.msra.mxu0 %v5223_v63 }
 0x702   :  { %v3544_v6 = vpop.f32.mrb[16].mxu1  ;;  %v3626_v7 = vpop.f32.mrb[20].mxu0 }
 0x703   :  { %v4542_v8 = vadd.f32 %v3544_v6, %v2812_v2  ;;  %v4544_v9 = vadd.f32 %v3626_v7, %v2820_v3  ;;  %v3546_v10 = vpop.f32.mrb[17].mxu1  ;;  %v3628_v0 = vpop.f32.mrb[21].mxu0 }
 0x704   :  { %v4543_v12 = vadd.f32 %v3546_v10, %v2816_v4  ;;  %v4545_v14 = vadd.f32 %v3628_v0, %v2824_v5  ;;  %v3548_v15 = vpop.f32.mrb[18].mxu1  ;;  %v3630_v18 = vpop.f32.mrb[22].mxu0 }
 0x705   :  { %v3633_v21 = vmin.f32 %v4542_v8, 20.0  ;;  %v3635_v22 = vmin.f32 %v4544_v9, 20.0  ;;  %v3549_v23 = vpop.f32.mrb[19].mxu1  ;;  %v3631_v16 = vpop.f32.mrb[23].mxu0 }
 0x706   :  { %v3634_v25 = vmin.f32 %v4543_v12, 20.0  ;;  %v3636_v17 = vmin.f32 %v4545_v14, 20.0 }
 0x707   :  { %v3637_v26 = vmul.f32 1.442695, %v3633_v21  ;;  %v3641_v19 = vmul.f32 1.442695, %v3635_v22 }
 0x708   :  { %v3639_v27 = vmul.f32 1.442695, %v3634_v25  ;;  %v3643_v20 = vmul.f32 1.442695, %v3636_v17 }
 0x709   :  { %5280 = vpow2.f32 %v3637_v26 }
 0x70a   :  { %5282 = vpow2.f32 %v3641_v19 }
 0x70b   :  { %5284 = vpow2.f32 %v3639_v27 }
 0x70c   :  { %5286 = vpow2.f32 %v3643_v20 }
 0x713   :  { %v5281_v28 = vpop.eup %5280 }
 0x714   :  { %v5283_v29 = vpop.eup %5282  ;;  %v3645_v31 = vadd.f32 2.0, %v5281_v28 }
 0x715   :  { %v5285_v36 = vpop.eup %5284  ;;  %v3647_v32 = vadd.f32 2.0, %v5283_v29 }
 0x716   :  { %v5287_v33 = vpop.eup %5286  ;;  %v3649_v34 = vmul.f32 %v5281_v28, %v3645_v31  ;;  %v3646_v35 = vadd.f32 2.0, %v5285_v36 }
 0x717   :  { %v3651_v37 = vmul.f32 %v5283_v29, %v3647_v32  ;;  %v3648_v24 = vadd.f32 2.0, %v5287_v33 }
 0x718   :  { %v3653_v38 = vadd.f32 2.0, %v3649_v34  ;;  %v3650_v13 = vmul.f32 %v5285_v36, %v3646_v35 }
 0x719   :  { %v3655_v39 = vadd.f32 2.0, %v3651_v37  ;;  %v3652_v40 = vmul.f32 %v5287_v33, %v3648_v24 }
 0x71a   :  { %5288 = vrcp.f32 %v3653_v38  ;;  %v3654_v41 = vadd.f32 2.0, %v3650_v13 }
 0x71b   :  { %5290 = vrcp.f32 %v3655_v39  ;;  %v3656_v30 = vadd.f32 2.0, %v3652_v40 }
 0x71c   :  { %5292 = vrcp.f32 %v3654_v41 }
 0x71d   :  { %5294 = vrcp.f32 %v3656_v30 }
 0x724   :  { %v5289_v42 = vpop.eup %5288 }
 0x725   :  { %v5291_v43 = vpop.eup %5290  ;;  %v3661_v44 = vmul.f32 %v5289_v42, %v3649_v34 }
 0x726   :  { %v5293_v45 = vpop.eup %5292  ;;  %v3663_v46 = vmul.f32 %v5291_v43, %v3651_v37 }
 0x727   :  { %v5295_v47 = vpop.eup %5294  ;;  %v3662_v11 = vmul.f32 %v5293_v45, %v3650_v13  ;;  %v3665_v48 = vmul.f32 %v4542_v8, %v3661_v44 }
 0x728   :  { %v3664_v49 = vmul.f32 %v5295_v47, %v3652_v40  ;;  %v3667_v50 = vmul.f32 %v4544_v9, %v3663_v46 }
 0x729   :  { %v3666_v51 = vmul.f32 %v4543_v12, %v3662_v11  ;;  %v3669_v54 = vpack.c.bf16 %v3665_v48, %v3665_v48 }
 0x72a   :  { %v3668_v52 = vmul.f32 %v4545_v14, %v3664_v49  ;;  %v3671_v56 = vpack.c.bf16 %v3667_v50, %v3667_v50 }
 0x72b   :  { %v3670_v53 = vpack.c.bf16 %v3666_v51, %v3666_v51 }
 0x72c   :  { %v3672_v55 = vpack.c.bf16 %v3668_v52, %v3668_v52 }
 0x72d   :  { %3968 = vmatprep.mubr.bf16.mxu1 %v3670_v53 }
 0x72e   :  { %4008 = vmatprep.mubr.bf16.mxu0 %v3672_v55  ;;  %3969 = vmatmul.mubr.bf16.vlgmr.msra.gmra.mrb[20].mxu1 %v3669_v54 }
 0x72f   :  { %4009 = vmatmul.mubr.bf16.vlgmr.msra.gmra.mrb[24].mxu0 %v3671_v56 }
 0x801   :  { %v4496_v57 = vpop.f32.mrb[20].mxu1 }
 0x802   :  { %v4518_v58 = vpop.f32.mrb[24].mxu0  ;;  %v4497_v60 = vpop.f32.mrb[21].mxu1 }
 0x803   :  { %v4498_v61 = vadd.f32 %v4497_v60, %v4496_v57  ;;  %v4519_v62 = vpop.f32.mrb[25].mxu0  ;;  %v4499_v63 = vpop.f32.mrb[22].mxu1 }
 0x804   :  { %v4520_v1 = vadd.f32 %v4519_v62, %v4518_v58  ;;  %v4521_v2 = vpop.f32.mrb[26].mxu0  ;;  %v4500_v3 = vpop.f32.mrb[23].mxu1 }
 0x805   :  { %v3971_v4 = vadd.f32 %v4498_v61, %v4444_v59  ;;  %v4522_v5 = vpop.f32.mrb[27].mxu0 }
 0x807   :  { %v4011_v6 = vadd.f32 %v4520_v1, %v3971_v4 }
 0x809   :  { %4016 = vst [vmem:[#allocation16] sm:$0xff] %v4011_v6 }
 0x80a   :  { %5483 = shalt.err (!%p5480_p12)
}
 0x80b   :  { %s5484_s25 = scalar_lea.hbm %s5884_s17, 128 }
 0x80c   :  { %p5485_p13 = scmp.ne.s32.totalorder %s5884_s17, %s5484_s25  ;;  %p5488_p0 = scmp.lt.u32.totalorder %s5484_s25, %s5884_s17 }
 0x80e   :  { %p5490_p1 = pnand %p5488_p0, %p5485_p13 }
 0x810   :  { %5493 = shalt.err (!%p5490_p1)
}
 0x811   :  { %4026 = dma.vmem_to_hbm [thread:$0]  %s4024_s28, 128, %s5884_s17, [#allocation4]  }
 0x812   :  { %5504 = dma.done.wait [#allocation4], 128  }
 0x813   :  { %5505 = vsyncadd [#allocation4], 4294967168 }
 0x814   :  { %4030 = vsyncpa [#allocation3], 1 }
 0x815   :  { %4031 = vsyncpa [#allocation6], 1 }
 0x816   :  { %4032 = vsyncpa [#allocation9], 1 }
 0x817   :  { %4033 = vsyncpa [#allocation12], 1 }
 0x818   :  { %4034 = vsyncpa [#allocation15], 1 }
 0x819   :  { %4035 = vsyncpa [#allocation4], 1 }

</bundles_post_ra>
